<compile_context>
chip_gen: v7x
topology: tpu7x:2x2x1
jax: 0.10.0
libtpu: 0.0.40
codegen_flags: <defaults>
</compile_context>

<pallas_src>
import functools

import jax
import jax.numpy as jnp
from jax import lax
from jax.experimental import pallas as pl
from jax.experimental.pallas import tpu as pltpu


def _round_up(a, b):
    return (a + b - 1) // b * b


def _dcn_kernel(idx_ref, wts_ref, x_ref, w_ref, o_ref, acc_ref, *, W, HW, matmul_dtype):
    """One (batch, P-tile, kernel-tap) grid step.

    idx_ref : (1, 1, 1, TP) int32  flat index of top-left corner (mod HW)
    wts_ref : (1, 1, 4, TP) f32    factorized weights [ax0, ax1, ay0, ay1]
                                   (x-terms carry validity * modulation mask,
                                    y-terms carry validity)
    x_ref   : (1, C_in, HW) f32    input feature map (flattened spatial)
    w_ref   : (1, C_out, C_in) f32 conv weight for this tap
    o_ref   : (1, C_out, TP)       output tile
    acc_ref : (C_out, TP) f32      VMEM accumulator over the KK taps
    """
    k = pl.program_id(2)

    @pl.when(k == 0)
    def _init():
        acc_ref[...] = jnp.zeros_like(acc_ref)

    idx = idx_ref[0, 0]                                  # (1, TP) int32
    wts = wts_ref[0, 0]                                  # (4, TP) f32
    tp = idx.shape[-1]

    hw_iota = lax.broadcasted_iota(jnp.int32, (HW, tp), 0)
    onehot = (hw_iota == idx).astype(jnp.float32)        # (HW, TP), one 1 per column

    # Factorized bilinear scatter matrix.  Rolls are along the flattened-HW
    # (sublane) axis and go to the XLU; per-column (lane-broadcast) weights
    # commute with them, so 2 rolls cover all 4 corners:
    #   top-right = base+1, bottom row = base+W / base+W+1.
    # Wrapping is safe: any corner that would land out of bounds already has a
    # zero (validity-masked) weight.
    x_row = onehot * wts[0:1] + pltpu.roll(onehot, 1, axis=0) * wts[1:2]
    A = x_row * wts[2:3] + pltpu.roll(x_row, W, axis=0) * wts[3:4]

    # Gather + bilinear blend + modulation as one MXU matmul (contraction over
    # HW), then a tiny matmul folds in this tap's conv weight.
    col = jnp.dot(x_ref[0].astype(matmul_dtype), A.astype(matmul_dtype),
                  preferred_element_type=jnp.float32)            # (C_in, TP)
    acc_ref[...] += jnp.dot(w_ref[0], col,
                            preferred_element_type=jnp.float32)  # (C_out, TP)

    @pl.when(k == pl.num_programs(2) - 1)
    def _store():
        o_ref[0] = acc_ref[...].astype(o_ref.dtype)


def _sampling_positions(offset, K, H_out, W_out, stride, padding, dilation):
    """Absolute sampling positions per (tap, out-pixel): base grid + offset."""
    B = offset.shape[0]
    KK = K * K
    off = offset.reshape(B, KK, 2, H_out, W_out)
    off_y = off[:, :, 0]                                   # (B, KK, Ho, Wo)
    off_x = off[:, :, 1]
    grid_y = jnp.arange(H_out, dtype=jnp.float32) * stride - padding
    grid_x = jnp.arange(W_out, dtype=jnp.float32) * stride - padding
    ky = jnp.arange(K, dtype=jnp.float32) * dilation
    kx = jnp.arange(K, dtype=jnp.float32) * dilation
    base_y = jnp.broadcast_to(
        ky[:, None, None, None] + grid_y[None, None, :, None],
        (K, K, H_out, W_out)).reshape(KK, H_out, W_out)
    base_x = jnp.broadcast_to(
        kx[None, :, None, None] + grid_x[None, None, None, :],
        (K, K, H_out, W_out)).reshape(KK, H_out, W_out)
    return off_y + base_y[None], off_x + base_x[None]      # (B, KK, Ho, Wo)


def _gather_inputs(offset, mask, K, H, W, H_out, W_out, stride, padding, dilation):
    """Precompute per-tap corner index + factorized masked bilinear weights."""
    B = offset.shape[0]
    KK = K * K
    P = H_out * W_out
    HW = H * W
    py, px = _sampling_positions(offset, K, H_out, W_out, stride, padding, dilation)
    py = py.reshape(B, KK, P).astype(jnp.float32)
    px = px.reshape(B, KK, P).astype(jnp.float32)
    m = mask.reshape(B, KK, P).astype(jnp.float32)

    y0f = jnp.floor(py)
    x0f = jnp.floor(px)
    ly = py - y0f
    lx = px - x0f
    hy = 1.0 - ly
    hx = 1.0 - lx
    y0 = y0f.astype(jnp.int32)
    x0 = x0f.astype(jnp.int32)
    y1 = y0 + 1
    x1 = x0 + 1
    # Per-axis factorized corner weights with zero padding outside the image
    # (matches torchvision bilinear_interpolate); modulation mask folded into
    # the x-terms exactly once.  Corner weight (i, j) = ay_i * ax_j.
    ax0 = jnp.where((x0 >= 0) & (x0 < W), hx, 0.0) * m
    ax1 = jnp.where((x1 >= 0) & (x1 < W), lx, 0.0) * m
    ay0 = jnp.where((y0 >= 0) & (y0 < H), hy, 0.0)
    ay1 = jnp.where((y1 >= 0) & (y1 < H), ly, 0.0)
    wts = jnp.stack([ax0, ax1, ay0, ay1], axis=2)                       # (B, KK, 4, P)
    # base (top-left) flat index, taken mod HW so relative corner offsets
    # +1/+W/+W+1 remain exact under the kernel's roll-based derivation even
    # for negative coordinates.
    idx = jnp.mod(y0 * W + x0, HW).astype(jnp.int32)[:, :, None, :]     # (B, KK, 1, P)
    return idx, wts


def modulated_deform_conv(x, offset, mask, weight, stride=1, padding=0, dilation=1,
                          *, tile_p=512, matmul_dtype=jnp.float32):
    """Pallas implementation of ModulatedDeformConv.forward (groups=dg=1, no bias)."""
    B, C_in, H, W = x.shape
    C_out, C_in_w, K, K2 = weight.shape
    assert K == K2
    assert C_in_w == C_in, "groups != 1 not supported"
    H_out = (H + 2 * padding - dilation * (K - 1) - 1) // stride + 1
    W_out = (W + 2 * padding - dilation * (K - 1) - 1) // stride + 1
    KK = K * K
    P = H_out * W_out
    HW = H * W

    idx, wts = _gather_inputs(offset, mask, K, H, W, H_out, W_out,
                              stride, padding, dilation)

    # Lane-dense P tiling: TP multiple of 128; pad P so the grid divides evenly.
    # Padded columns carry zero weights -> zero output, sliced off at the end.
    # (Shrink tile_p for v7x's 64 MiB VMEM if HW is large.)
    tile_p = _round_up(tile_p, 128)
    TP = min(tile_p, _round_up(P, 128))
    P_pad = _round_up(P, TP)
    if P_pad != P:
        pad = ((0, 0), (0, 0), (0, 0), (0, P_pad - P))
        idx = jnp.pad(idx, pad)
        wts = jnp.pad(wts, pad)

    x_flat = x.reshape(B, C_in, HW).astype(jnp.float32)
    # w_t[kk, co, ci] = weight[co, ci, ki, kj] with kk = ki*K + kj
    w_t = jnp.transpose(weight.reshape(C_out, C_in, KK), (2, 0, 1)).astype(jnp.float32)

    kernel = functools.partial(_dcn_kernel, W=W, HW=HW, matmul_dtype=matmul_dtype)

    n_pt = P_pad // TP
    flops = int(2 * B * n_pt * KK * (C_in * HW * TP      # gather/bilinear matmul
                                     + C_out * C_in * TP))  # per-tap weight matmul
    bytes_accessed = int(4 * (idx.size + wts.size + B * C_in * HW
                              + B * n_pt * KK * C_out * C_in
                              + B * C_out * P_pad))

    out = pl.pallas_call(
        kernel,
        out_shape=jax.ShapeDtypeStruct((B, C_out, P_pad), jnp.float32),
        grid_spec=pltpu.PrefetchScalarGridSpec(
            num_scalar_prefetch=0,
            grid=(B, n_pt, KK),
            in_specs=[
                pl.BlockSpec((1, 1, 1, TP), lambda b, j, k: (b, k, 0, j)),    # idx
                pl.BlockSpec((1, 1, 4, TP), lambda b, j, k: (b, k, 0, j)),    # weights
                pl.BlockSpec((1, C_in, HW), lambda b, j, k: (b, 0, 0)),       # x (resident per b)
                pl.BlockSpec((1, C_out, C_in), lambda b, j, k: (k, 0, 0)),    # conv weight tap
            ],
            out_specs=pl.BlockSpec((1, C_out, TP), lambda b, j, k: (b, 0, j)),
            scratch_shapes=[pltpu.VMEM((C_out, TP), jnp.float32)],
        ),
        compiler_params=pltpu.CompilerParams(
            dimension_semantics=("parallel", "parallel", "arbitrary"),
        ),
        cost_estimate=pl.CostEstimate(flops=flops, transcendentals=0,
                                      bytes_accessed=bytes_accessed),
    )(idx, wts, x_flat, w_t)

    return out[:, :, :P].reshape(B, C_out, H_out, W_out)


def ref_modulated_deform_conv(x, offset, mask, weight, stride=1, padding=0, dilation=1):
    """Pure-JAX (gather-based) reference for verification."""
    B, C_in, H, W = x.shape
    C_out, _, K, _ = weight.shape
    H_out = (H + 2 * padding - dilation * (K - 1) - 1) // stride + 1
    W_out = (W + 2 * padding - dilation * (K - 1) - 1) // stride + 1
    KK = K * K
    P = H_out * W_out

    pos_y, pos_x = _sampling_positions(offset, K, H_out, W_out, stride, padding, dilation)
    py = pos_y.reshape(B, KK * P)
    px = pos_x.reshape(B, KK * P)
    mod = mask.reshape(B, KK * P).astype(jnp.float32)
    x_flat = jnp.transpose(x, (0, 2, 3, 1)).reshape(B, H * W, C_in)

    y0f = jnp.floor(py)
    x0f = jnp.floor(px)
    ly = py - y0f
    lx = px - x0f
    hy = 1.0 - ly
    hx = 1.0 - lx
    y0 = y0f.astype(jnp.int32)
    x0 = x0f.astype(jnp.int32)

    def corner(yi, xi, wgt):
        valid = (yi >= 0) & (yi <= H - 1) & (xi >= 0) & (xi <= W - 1)
        idx = jnp.clip(yi, 0, H - 1) * W + jnp.clip(xi, 0, W - 1)
        v = jnp.take_along_axis(x_flat, idx[:, :, None], axis=1)        # (B, S, C)
        return v * (jnp.where(valid, wgt, 0.0) * mod)[:, :, None]

    col = (corner(y0, x0, hy * hx) + corner(y0, x0 + 1, hy * lx)
           + corner(y0 + 1, x0, ly * hx) + corner(y0 + 1, x0 + 1, ly * lx))
    col = col.reshape(B, KK, P, C_in)
    wr = weight.reshape(C_out, C_in, KK)
    out = jnp.einsum('bkpc,ock->bop', col, wr)
    return out.reshape(B, C_out, H_out, W_out)


if __name__ == "__main__":
    # ModulatedDeformConv(in_channels=4, out_channels=8, kernel_size=3,
    #                     stride=1, padding=1, dilation=1, groups=1, deformable_groups=1)
    B, C_in, C_out, H, W = 2, 4, 8, 16, 16
    K, stride, padding, dilation = 3, 1, 1, 1
    deformable_groups = 1
    H_out = (H + 2 * padding - dilation * (K - 1) - 1) // stride + 1
    W_out = (W + 2 * padding - dilation * (K - 1) - 1) // stride + 1

    key = jax.random.PRNGKey(0)
    kx, ko, km, kw = jax.random.split(key, 4)
    x = jax.random.normal(kx, (B, C_in, H, W), jnp.float32)
    offset = 2.0 * jax.random.normal(
        ko, (B, 2 * deformable_groups * K * K, H_out, W_out), jnp.float32)
    mask = jax.nn.sigmoid(jax.random.normal(
        km, (B, deformable_groups * K * K, H_out, W_out), jnp.float32))
    # deterministic stand-in for nn.Parameter weight (C_out, C_in, K, K)
    weight = 0.1 * jax.random.normal(kw, (C_out, C_in, K, K), jnp.float32)

    ref = ref_modulated_deform_conv(x, offset, mask, weight, stride, padding, dilation)

    # f32 MXU path (tight check).
    out = modulated_deform_conv(x, offset, mask, weight, stride, padding, dilation)
    out = jax.block_until_ready(out)
    assert out.shape == (B, C_out, H_out, W_out), out.shape
    if not jnp.allclose(out, ref, atol=1e-3, rtol=1e-3):
        raise AssertionError(
            f"f32 mismatch vs reference, max abs err = {float(jnp.max(jnp.abs(out - ref)))}")

    # bf16 MXU-input path (looser tolerance, f32 accumulation).
    out_bf = modulated_deform_conv(x, offset, mask, weight, stride, padding, dilation,
                                   matmul_dtype=jnp.bfloat16)
    out_bf = jax.block_until_ready(out_bf)
    if not jnp.allclose(out_bf, ref, atol=3e-2, rtol=3e-2):
        raise AssertionError(
            f"bf16 mismatch vs reference, max abs err = {float(jnp.max(jnp.abs(out_bf - ref)))}")

    print("KERNEL_OK")
</pallas_src>

<mosaic_0001>
module attributes {stable_mosaic.version = 11 : i64} {
  func.func @_dcn_kernel(%arg0: i32, %arg1: i32, %arg2: i32, %arg3: memref<1x1x1x256xi32, #tpu.memory_space<vmem>>, %arg4: memref<1x1x4x256xf32, #tpu.memory_space<vmem>>, %arg5: memref<1x4x256xf32, #tpu.memory_space<vmem>>, %arg6: memref<1x8x4xf32, #tpu.memory_space<vmem>>, %arg7: memref<1x8x256xf32, #tpu.memory_space<vmem>>, %arg8: memref<8x256xf32, #tpu.memory_space<vmem>>) attributes {dimension_semantics = [#tpu.dimension_semantics<parallel>, #tpu.dimension_semantics<parallel>, #tpu.dimension_semantics<arbitrary>], iteration_bounds = array<i64: 2, 1, 9>, scalar_prefetch = 0 : i64, scratch_operands = 1 : i64, tpu.core_type = #tpu.core_type<tc>, window_params = [{transform_indices = @transform_0, window_bounds = array<i64: 1, 1, 1, 256>}, {transform_indices = @transform_1, window_bounds = array<i64: 1, 1, 4, 256>}, {transform_indices = @transform_2, window_bounds = array<i64: 1, 4, 256>}, {transform_indices = @transform_3, window_bounds = array<i64: 1, 8, 4>}, {transform_indices = @transform_4, window_bounds = array<i64: 1, 8, 256>}]} {
    %c0_i32 = arith.constant 0 : i32
    %0 = arith.cmpi eq, %arg2, %c0_i32 : i32
    %1 = arith.extui %0 : i1 to i32
    %c0_i32_0 = arith.constant 0 : i32
    %2 = arith.cmpi ne, %1, %c0_i32_0 : i32
    scf.if %2 {
      %cst_20 = arith.constant 0.000000e+00 : f32
      %40 = vector.broadcast %cst_20 : f32 to vector<8x256xf32>
      %c0_21 = arith.constant 0 : index
      %c0_22 = arith.constant 0 : index
      %41 = vector.load %arg8[%c0_21, %c0_22] : memref<8x256xf32, #tpu.memory_space<vmem>>, vector<8x256xf32>
      tpu.vector_store %arg8[%c0_21, %c0_22], %40 {strides = array<i32>} : memref<8x256xf32, #tpu.memory_space<vmem>>, vector<8x256xf32>,
    } else {
    }
    %c0 = arith.constant 0 : index
    %c0_1 = arith.constant 0 : index
    %c0_2 = arith.constant 0 : index
    %c0_3 = arith.constant 0 : index
    %3 = vector.load %arg3[%c0, %c0_1, %c0_2, %c0_3] : memref<1x1x1x256xi32, #tpu.memory_space<vmem>>, vector<1x1x1x256xi32>
    %4 = vector.shape_cast %3 : vector<1x1x1x256xi32> to vector<1x256xi32>
    %c0_4 = arith.constant 0 : index
    %c0_5 = arith.constant 0 : index
    %c0_6 = arith.constant 0 : index
    %c0_7 = arith.constant 0 : index
    %5 = vector.load %arg4[%c0_4, %c0_5, %c0_6, %c0_7] : memref<1x1x4x256xf32, #tpu.memory_space<vmem>>, vector<1x1x4x256xf32>
    %6 = vector.shape_cast %5 : vector<1x1x4x256xf32> to vector<4x256xf32>
    %7 = tpu.iota {dimensions = array<i32: 0>} : vector<256x256xi32>
    %8 = vector.broadcast %4 : vector<1x256xi32> to vector<256x256xi32>
    %9 = arith.cmpi eq, %7, %8 : vector<256x256xi32>
    %10 = arith.extui %9 : vector<256x256xi1> to vector<256x256xi32>
    %11 = arith.sitofp %10 : vector<256x256xi32> to vector<256x256xf32>
    %12 = vector.extract_strided_slice %6 {offsets = [0, 0], sizes = [1, 256], strides = [1, 1]} : vector<4x256xf32> to vector<1x256xf32>
    %13 = vector.broadcast %12 : vector<1x256xf32> to vector<256x256xf32>
    %14 = arith.mulf %11, %13 : vector<256x256xf32>
    %c1_i32 = arith.constant 1 : i32
    %15 = tpu.dynamic_rotate %11 by %c1_i32 dim 0 : vector<256x256xf32>, i32 -> vector<256x256xf32>
    %16 = vector.extract_strided_slice %6 {offsets = [1, 0], sizes = [1, 256], strides = [1, 1]} : vector<4x256xf32> to vector<1x256xf32>
    %17 = vector.broadcast %16 : vector<1x256xf32> to vector<256x256xf32>
    %18 = arith.mulf %15, %17 : vector<256x256xf32>
    %19 = arith.addf %14, %18 : vector<256x256xf32>
    %20 = vector.extract_strided_slice %6 {offsets = [2, 0], sizes = [1, 256], strides = [1, 1]} : vector<4x256xf32> to vector<1x256xf32>
    %21 = vector.broadcast %20 : vector<1x256xf32> to vector<256x256xf32>
    %22 = arith.mulf %19, %21 : vector<256x256xf32>
    %c16_i32 = arith.constant 16 : i32
    %23 = tpu.dynamic_rotate %19 by %c16_i32 dim 0 : vector<256x256xf32>, i32 -> vector<256x256xf32>
    %24 = vector.extract_strided_slice %6 {offsets = [3, 0], sizes = [1, 256], strides = [1, 1]} : vector<4x256xf32> to vector<1x256xf32>
    %25 = vector.broadcast %24 : vector<1x256xf32> to vector<256x256xf32>
    %26 = arith.mulf %23, %25 : vector<256x256xf32>
    %27 = arith.addf %22, %26 : vector<256x256xf32>
    %c0_8 = arith.constant 0 : index
    %c0_9 = arith.constant 0 : index
    %c0_10 = arith.constant 0 : index
    %28 = vector.load %arg5[%c0_8, %c0_9, %c0_10] : memref<1x4x256xf32, #tpu.memory_space<vmem>>, vector<1x4x256xf32>
    %29 = vector.shape_cast %28 : vector<1x4x256xf32> to vector<4x256xf32>
    %cst = arith.constant dense<0.000000e+00> : vector<4x256xf32>
    %30 = tpu.matmul %29, %27, %cst {dimension_numbers = #tpu.dot_dimension_numbers<[1], [0], [0], [1], [0, 0, 1, 1], [], []>} : vector<4x256xf32>, vector<256x256xf32>, vector<4x256xf32> -> vector<4x256xf32>
    %c0_11 = arith.constant 0 : index
    %c0_12 = arith.constant 0 : index
    %31 = vector.load %arg8[%c0_11, %c0_12] : memref<8x256xf32, #tpu.memory_space<vmem>>, vector<8x256xf32>
    %c0_13 = arith.constant 0 : index
    %c0_14 = arith.constant 0 : index
    %c0_15 = arith.constant 0 : index
    %32 = vector.load %arg6[%c0_13, %c0_14, %c0_15] : memref<1x8x4xf32, #tpu.memory_space<vmem>>, vector<1x8x4xf32>
    %33 = vector.shape_cast %32 : vector<1x8x4xf32> to vector<8x4xf32>
    %cst_16 = arith.constant dense<0.000000e+00> : vector<8x256xf32>
    %34 = tpu.matmul %33, %30, %cst_16 {dimension_numbers = #tpu.dot_dimension_numbers<[1], [0], [0], [1], [0, 0, 1, 1], [], []>} : vector<8x4xf32>, vector<4x256xf32>, vector<8x256xf32> -> vector<8x256xf32>
    %35 = arith.addf %31, %34 : vector<8x256xf32>
    %c0_17 = arith.constant 0 : index
    %c0_18 = arith.constant 0 : index
    %36 = vector.load %arg8[%c0_17, %c0_18] : memref<8x256xf32, #tpu.memory_space<vmem>>, vector<8x256xf32>
    tpu.vector_store %arg8[%c0_17, %c0_18], %35 {strides = array<i32>} : memref<8x256xf32, #tpu.memory_space<vmem>>, vector<8x256xf32>,
    %c8_i32 = arith.constant 8 : i32
    %37 = arith.cmpi eq, %arg2, %c8_i32 : i32
    %38 = arith.extui %37 : i1 to i32
    %c0_i32_19 = arith.constant 0 : i32
    %39 = arith.cmpi ne, %38, %c0_i32_19 : i32
    scf.if %39 {
      %c0_20 = arith.constant 0 : index
      %c0_21 = arith.constant 0 : index
      %40 = vector.load %arg8[%c0_20, %c0_21] : memref<8x256xf32, #tpu.memory_space<vmem>>, vector<8x256xf32>
      %c0_22 = arith.constant 0 : index
      %c0_23 = arith.constant 0 : index
      %c0_24 = arith.constant 0 : index
      %41 = vector.load %arg7[%c0_22, %c0_23, %c0_24] : memref<1x8x256xf32, #tpu.memory_space<vmem>>, vector<1x8x256xf32>
      %42 = vector.shape_cast %41 : vector<1x8x256xf32> to vector<8x256xf32>
      %43 = vector.shape_cast %40 : vector<8x256xf32> to vector<1x8x256xf32>
      tpu.vector_store %arg7[%c0_22, %c0_23, %c0_24], %43 {strides = array<i32>} : memref<1x8x256xf32, #tpu.memory_space<vmem>>, vector<1x8x256xf32>,
    } else {
    }
    return
  }
  func.func @transform_0(%arg0: i32, %arg1: i32, %arg2: i32) -> (i32, i32, i32, i32) {
    %c0_i32 = arith.constant 0 : i32
    %c0_i32_0 = arith.constant 0 : i32
    return %arg0, %arg2, %c0_i32, %arg1 : i32, i32, i32, i32
  }
  func.func @transform_1(%arg0: i32, %arg1: i32, %arg2: i32) -> (i32, i32, i32, i32) {
    %c0_i32 = arith.constant 0 : i32
    %c0_i32_0 = arith.constant 0 : i32
    return %arg0, %arg2, %c0_i32, %arg1 : i32, i32, i32, i32
  }
  func.func @transform_2(%arg0: i32, %arg1: i32, %arg2: i32) -> (i32, i32, i32) {
    %c0_i32 = arith.constant 0 : i32
    %c0_i32_0 = arith.constant 0 : i32
    %c0_i32_1 = arith.constant 0 : i32
    return %arg0, %c0_i32, %c0_i32_0 : i32, i32, i32
  }
  func.func @transform_3(%arg0: i32, %arg1: i32, %arg2: i32) -> (i32, i32, i32) {
    %c0_i32 = arith.constant 0 : i32
    %c0_i32_0 = arith.constant 0 : i32
    %c0_i32_1 = arith.constant 0 : i32
    return %arg2, %c0_i32, %c0_i32_0 : i32, i32, i32
  }
  func.func @transform_4(%arg0: i32, %arg1: i32, %arg2: i32) -> (i32, i32, i32) {
    %c0_i32 = arith.constant 0 : i32
    %c0_i32_0 = arith.constant 0 : i32
    return %arg0, %c0_i32, %arg1 : i32, i32, i32
  }
}

</mosaic_0001>

<bundles_post_ra>
// kernel: tpu_custom_call.1
= control target key start
LH: loop header
LB: loop body
LE: loop exit
PB: predicated region body
PF: predicated region fallthrough
CT: control target
= control target key end

     0   :  { %s2864_s0 = inlined_call_operand.vmem [shape: s32[2,9,1,256], index: 0, kind: input, shape index: {}]   ;;  %s2865_s1 = inlined_call_operand.hbm [shape: f32[2,9,4,256], index: 1, kind: input, shape index: {}]   ;;  %s2866_s2 = inlined_call_operand.vmem [shape: f32[2,4,256], index: 2, kind: input, shape index: {}]   ;;  %s2867_s3 = inlined_call_operand.vmem [shape: f32[9,8,4], index: 3, kind: input, shape index: {}]   ;;  %s2868_s4 = inlined_call_operand.hbm [shape: f32[2,8,256], index: 4, kind: output, shape index: {}]  }
   0x1   :  { %2877 = sst [smem:[#allocation17_spill]] %s2865_s1 }
   0x2   :  { %9 = vsyncpa [#allocation4], 0 }
   0x3   :  { %11 = vsyncpa [#allocation4 + $0x1], 0 }
   0x4   :  { %12 = vsyncpa [#allocation5], 0 }
   0x5   :  { %14 = vsyncpa [#allocation5 + $0x1], 0  ;;  %s1926_s15 = smov 0   ;;  %s1928_s16 = smov 0  }
   0x6   :  { %s1930_s17 = smov 0   ;;  %s1932_s18 = smov 0  }
   0x7   :  { %s1934_s19 = smov 0   ;;  %s1936_s20 = smov 0  }
   0x8   :  { %s1938_s21 = smov 0   ;;  %s1940_s22 = smov 0  }
   0x9   :  { %s1942_s23 = smov 0   ;;  %s1944_s24 = smov 0  }
   0xa   :  { %s1946_s25 = smov 0  }
   0xb LB: > { %2878 = sst [smem:[#allocation9_spill]] %s1871_s19  ;;  %s1482_s26 = sadd.s32 4294967295, %s1895_s25   ;;  %s1895_s25 = sphi %s1946_s25, %s20_s25   ;;  %s1891_s24 = sphi %s1944_s24, %s2904_s24   ;;  %s1887_s23 = sphi %s1942_s23, %s2903_s23   ;;  %s1883_s22 = sphi %s1940_s22, %s2902_s22   ;;  %s1879_s21 = sphi %s1938_s21, %s2901_s21   ;;  %s1875_s20 = sphi %s1936_s20, %s2900_s20   ;;  %s1871_s19 = sphi %s1934_s19, %s2899_s19   ;;  %s1867_s18 = sphi %s1932_s18, %s2898_s18   ;;  %s1863_s17 = sphi %s1930_s17, %s2907_s17   ;;  %s1859_s16 = sphi %s1928_s16, %s2906_s16   ;;  %s1855_s15 = sphi %s1926_s15, %s2905_s15  }
   0xc   : > { %2879 = sst [smem:[#allocation10_spill]] %s1875_s20  ;;  %s1483_s27 = sadd.s32 4294967294, %s1895_s25  }
   0xd   : > { %2880 = sst [smem:[#allocation11_spill]] %s1887_s23  ;;  %s32_s28 = sadd.s32 1, %s1887_s23 }
   0xe   : > { %2881 = sst [smem:[#allocation12_spill]] %s1891_s24  ;;  %s39_s29 = sadd.s32 1, %s1891_s24 }
   0xf   : > { %p33_p0 = scmp.ge.s32.totalorder %s32_s28, 9  ;;  %s80_s30 = sadd.s32 1, %s1875_s20 }
  0x10   : > { %p87_p1 = scmp.ne.s32.totalorder %s1875_s20, %s1871_s19  ;;  %p88_p2 = scmp.eq.s32.totalorder %s1895_s25, 0 }
  0x11   : > { %s2909_s28 = smov (%p33_p0, %s32_s28), 0  ;;  %s2911_s29 = smov (!%p33_p0, %s39_s29), %s1891_s24 }
  0x12   : > { %2882 = sst [smem:[#allocation13_spill]] %s2909_s28  ;;  %s74_s5 = ssub.s32 %s1887_s23, %s2909_s28 }
  0x13   : > { %p1992_p3 = por %p88_p2, %p87_p1  ;;  %p41_p4 = scmp.ge.s32.totalorder %s2911_s29, 2 }
  0x14   : > { %p93_p5 = scmp.ne.s32.totalorder %s1871_s19, %s1867_s18  ;;  %p94_p6 = scmp.eq.s32.totalorder %s1482_s26, 0 }
  0x15   : > { %s160_s7 = sadd.s32 1, %s1863_s17  ;;  %s2913_s29 = smov (%p41_p4, %s2911_s29), 0 }
  0x16   : > { %2884 = sst [smem:[#allocation14_spill]] %s2913_s29  ;;  %p2000_p7 = por %p94_p6, %p93_p5 }
  0x17   : > { %p170_p8 = scmp.ne.s32.totalorder %s1863_s17, %s1859_s16  ;;  %s73_s9 = ssub.s32 %s1891_s24, %s2913_s29 }
  0x18   : > { %p171_p9 = scmp.eq.s32.totalorder %s1482_s26, 17  ;;  %s75_s10 = sor.u32 %s74_s5, %s73_s9 }
  0x19   : > { %p158_p10 = scmp.eq.s32.totalorder %s73_s9, 0  ;;  %p78_p11 = scmp.eq.s32.totalorder %s75_s10, 0 }
  0x1a   : > { %p2008_p12 = por %p171_p9, %p170_p8  ;;  %p176_p13 = scmp.ne.s32.totalorder %s1859_s16, %s1855_s15 }
  0x1b   : > { %s2013_s12 = scalar_select %p158_p10, %s1863_s17, %s160_s7  }
  0x1c   : > { %s2886_s11 = scalar_select %p2008_p12, 1, 0 }
  0x1d   : > { %2887 = sst [smem:[#allocation15_spill]] %s2013_s12  ;;  %p177_p0 = scmp.eq.s32.totalorder %s1483_s27, 17 }
  0x1e   : > { %s2016_s13 = scalar_select %p78_p11, %s1875_s20, %s80_s30  }
  0x1f   : > { %p1650_p1 = scmp.lt.s32.totalorder %s1895_s25, 18  ;;  %p2021_p2 = por %p177_p0, %p176_p13 }
  0x20   : > { %2888 = sst [smem:[#allocation16_spill]] %s2016_s13  ;;  %s213_s18 = sand.u32 1, %s1875_s20  }
  0x21   : > { %s2889_s14 = scalar_select %p2021_p2, 1, 0 }
  0x22   : > { %s1486_s26 = sshll.u32 %s213_s18, 3  ;;  %s1487_s5 = sshll.u32 %s1887_s23, 1 }
  0x23   : > { %s1636_s9 = smul.u32 18, %s1891_s24  ;;  %s217_s10 = scalar_lea.vmem [#allocation3], %s1486_s26 }
  0x24   : > { %s229_s29 = sshll.u32 %s217_s10, 4  ;;  %p2032_p4 = pnand %p1650_p1, %p1992_p3  ;;  %s2028_s29 = int_to_ptr.vmem [resolvable:$true] %s229_s29 }
  0x25   : > { %s225_s27 = sadd.s32 %s1636_s9, %s1487_s5  ;;  %s2891_s1 = sld [smem:[#allocation17_spill]] }
  0x26   : > { %s1488_s7 = sshll.u32 %s225_s27, 6  ;;  %s214_s6 = scalar_lea.sflag [#allocation4], %s213_s18 }
  0x27   : > { %p1745_p8 = pneg %p2032_p4 }
  0x2b   : > { %s2040_s20 = scalar_lea.hbm %s2891_s1, %s1488_s7  ;;  %s1748_s28 = scalar_lea.hbm %s2891_s1, 2304 }
  0x2c   : > { %s1743_s26 = scalar_lea.hbm %s2040_s20, 128  ;;  %p1749_p11 = scmp.lt.u32.totalorder %s2040_s20, %s2891_s1 }
  0x2d   : > { %p1744_p3 = scmp.ne.s32.totalorder %s2040_s20, %s1743_s26  ;;  %p1750_p13 = scmp.lt.u32.totalorder %s1748_s28, %s1743_s26 }
  0x2e   : > { %p1752_p1 = scmp.lt.u32.totalorder %s1743_s26, %s2040_s20 }
  0x2f   : > { %p1746_p9 = pnand %p1745_p8, %p1744_p3  ;;  %p1751_p0 = por %p1750_p13, %p1749_p11 }
  0x31   : > { %p1747_p10 = pneg %p1746_p9  ;;  %p1753_p5 = por %p1752_p1, %p1751_p0 }
  0x33   : > { %p1754_p6 = pnand %p1753_p5, %p1747_p10 }
  0x35   : > { %1757 = shalt.err (!%p1754_p6)
}
  0x36   : > { %s1758_s18 = scalar_lea.vmem %s2028_s29, 128  ;;  %s1897_s27 = smov [#allocation3]  }
  0x37   : > { %p1759_p3 = scmp.ne.s32.totalorder %s2028_s29, %s1758_s18  ;;  %s1763_s7 = sshll.u32 %s1897_s27, 4  ;;  %s1764_s7 = int_to_ptr.vmem [resolvable:$false] %s1763_s7 }
  0x38   : > { %s1765_s5 = scalar_lea.vmem %s1764_s7, 256  ;;  %p1766_p12 = scmp.lt.s32.totalorder %s2028_s29, %s1764_s7 }
  0x39   : > { %p1761_p9 = pnand %p1759_p3, %p1745_p8  ;;  %p1767_p11 = scmp.lt.s32.totalorder %s1765_s5, %s1758_s18 }
  0x3b   : > { %p1762_p2 = pneg %p1761_p9  ;;  %p1768_p13 = por %p1767_p11, %p1766_p12 }
  0x3d   : > { %p1769_p0 = pnand %p1768_p13, %p1762_p2 }
  0x3f   : > { %1772 = shalt.err (!%p1769_p0)
}
  0x40   : > { %1645 = dma.hbm_to_vmem [thread:$0]  (!%p2032_p4), %s2040_s20, 128, %s2028_s29, %s214_s6  }
  0x41   : > { %p2892_p5 = scmp.lt.s32.totalorder %s1895_s25, 19  ;;  %p2893_p6 = scmp.ge.s32.totalorder %s1895_s25, 1 }
  0x43   : > { %p250_p8 = pnand %p2893_p6, %p2892_p5 }
  0x44   : > { %s255_s26 = sand.u32 (!%p250_p8), 1, %s1871_s19  }
  0x45   : > { %253 = sbr.rel (%p250_p8) target bundleno = 756 (0x2f4), region = 36  ;;  %s2073_s9 = sshll.u32 (!%p250_p8), %s255_s26, 3 }
  0x46   : > { %s256_s28 = scalar_lea.sflag (!%p250_p8), [#allocation4], %s255_s26  ;;  %s259_s13 = scalar_lea.vmem (!%p250_p8), [#allocation3], %s2073_s9 }
  0x4c   : > { %1846 = dma.done.wait (%p2000_p7), %s256_s28, 128  }
  0x4d   : > { %1848 = vsyncadd (%p2000_p7), %s256_s28, 4294967168  ;;  %s2876_s20 = sand.u32 1, %s1859_s16   ;;  %p306_p12 = scmp.lt.s32.totalorder %s1883_s22, 1 }
  0x4e   : > { %s1491_s29 = sshll.u32 %s2876_s20, 4  ;;  %p308_p2 = scmp.lt.s32.totalorder %s1879_s21, 8 }
  0x4f   : > { %s307_s30 = scalar_select %p306_p12, %s1883_s22, 1 }
  0x50   : > { %s309_s6 = scalar_select %p308_p2, %s1879_s21, 8 }
  0x51   : > { %s1637_s10 = smul.u32 18, %s307_s30  ;;  %s1570_s18 = sshll.u32 %s307_s30, 3 }
  0x52   : > { %s1492_s27 = sshll.u32 %s309_s6, 1  ;;  %s2090_s8 = scalar_lea.vmem %s2866_s2, %s1570_s18 }
  0x53   : > { %s315_s26 = sadd.s32 %s1637_s10, %s1492_s27  ;;  %s1495_s9 = sshll.u32 %s309_s6, 3 }
  0x54   : > { %s316_s24 = scalar_lea.vmem %s2864_s0, %s315_s26  ;;  %s2098_s20 = scalar_lea.vmem %s2867_s3, %s1495_s9 }
  0x55   : > { %s2100_s12 = scalar_lea.vmem [#allocation6], %s1491_s29  ;;  %p1496_p7 = scmp.ne.s32.totalorder %s1879_s21, 0 }
  0x56   : > { %v1898_v0 = vmov (!%p1496_p7), 0.0  }
  0x57   : > { %332 = sbr.rel (%p1496_p7) target bundleno = 94 (0x5e), region = 44  ;;  %333 = vst [vmem:[#allocation2] sm:$0xff] (!%p1496_p7), %v1898_v0  ;;  %334 = vst [vmem:[#allocation2 + $0x8] sm:$0xff] (!%p1496_p7), %v1898_v0 }
  0x5e PF: > { %v337_v1 = vlaneseq  ;;  %v1899_v2 = vmov 0.0   ;;  %v335_v4 = vld [vmem:[%s316_s24] sm:$0x3]  ;;  %v2106_v5 = vld [vmem:[%s259_s13] sm:$0xff]  ;;  %p1564_p4 = scmp.ne.s32.totalorder %s1879_s21, 8 }
  0x5f   : > { %1309 = vmatprep.mubr.f32.mxu1 %v1899_v2 }
  0x60   : > { %v2104_v3 = vshrl.u32 %v337_v1, 7 }
  0x62   : > { %v339_v6 = vadd.s32 8, %v2104_v3  ;;  %v367_v7 = vadd.s32 232, %v2104_v3  ;;  %v2111_v8 = vadd.s32 240, %v2104_v3  ;;  %v2114_v9 = vadd.s32 248, %v2104_v3 }
  0x63   : > { %v372_v10 = vsub.s32 0, %v2104_v3  ;;  %v2118_v11 = vsub.s32 1, %v2104_v3  ;;  %v577_v12 = vsub.s32 4, %v2104_v3  ;;  %vm717_vm0 = vcmp.lt.s32.totalorder %v2104_v3, 1 }
  0x64   : > { %v788_v13 = vsub.s32 5, %v2104_v3  ;;  %v2124_v14 = vsub.s32 2, %v2104_v3  ;;  %v934_v15 = vsub.s32 6, %v2104_v3  ;;  %v2128_v16 = vsub.s32 3, %v2104_v3 }
  0x65   : > { %v2131_v17 = vrot.slane %v335_v4, %v2118_v11  ;;  %v578_v18 = vrot.slane %v2106_v5, %v577_v12  ;;  %v1016_v19 = vsub.s32 7, %v2104_v3  ;;  %v2135_v20 = vrot.slane %v335_v4, %v372_v10 }
  0x66   : > { %v789_v21 = vrot.slane %v2106_v5, %v788_v13  ;;  %v935_v22 = vrot.slane %v2106_v5, %v934_v15  ;;  %v574_v23 = vrot.slane %v2106_v5, %v372_v10  ;;  %v785_v24 = vrot.slane %v2106_v5, %v2118_v11 }
  0x67   : > { %vm379_vm1 = vcmp.eq.s32.totalorder %v2104_v3, %v2131_v17  ;;  %vm381_vm2 = vcmp.eq.s32.totalorder %v339_v6, %v2131_v17  ;;  %vm437_vm3 = vcmp.eq.s32.totalorder %v367_v7, %v2131_v17  ;;  %vm439_vm4 = vcmp.eq.s32.totalorder %v2111_v8, %v2131_v17 }
  0x68   : > { %vm441_vm5 = vcmp.eq.s32.totalorder %v2114_v9, %v2131_v17  ;;  %v1498_v25 = vsel %vm379_vm1, 1.0, %v1899_v2  ;;  %v2152_v26 = vsel %vm381_vm2, 1.0, %v1899_v2  ;;  %v2155_v27 = vsel %vm437_vm3, 1.0, %v1899_v2 }
  0x69   : > { %v1558_v28 = vsel %vm439_vm4, 1.0, %v1899_v2  ;;  %v1560_v29 = vsel %vm441_vm5, 1.0, %v1899_v2  ;;  %v2159_v30 = vrot.slane %v578_v18, %v372_v10  ;;  %v654_v31 = vrot.slane %v1498_v25, 7 }
  0x6a   : > { %v656_v32 = vrot.slane %v2152_v26, 7  ;;  %v712_v33 = vrot.slane %v2155_v27, 7  ;;  %v714_v34 = vrot.slane %v1558_v28, 7  ;;  %v716_v35 = vrot.slane %v1560_v29, 7 }
  0x6b   : > { %v590_v36 = vmul.f32 %v1498_v25, %v2159_v30  ;;  %v592_v37 = vmul.f32 %v2152_v26, %v2159_v30  ;;  %v650_v38 = vmul.f32 %v1558_v28, %v2159_v30  ;;  %v652_v39 = vmul.f32 %v1560_v29, %v2159_v30 }
  0x6c   : > { %v719_v40 = vsel %vm717_vm0, %v714_v34, %v716_v35  ;;  %v721_v41 = vsel %vm717_vm0, %v712_v33, %v714_v34  ;;  %v779_v42 = vsel %vm717_vm0, %v654_v31, %v656_v32  ;;  %v781_v43 = vsel %vm717_vm0, %v716_v35, %v654_v31 }
  0x6d   : > { %v2181_v44 = vrot.slane %v789_v21, %v2118_v11  ;;  %v2184_v45 = vrot.slane %v935_v22, %v2124_v14  ;;  %v1017_v46 = vrot.slane %v2106_v5, %v1016_v19  ;;  %vm378_vm6 = vcmp.eq.s32.totalorder %v2104_v3, %v2135_v20 }
  0x6e   : > { %vm380_vm7 = vcmp.eq.s32.totalorder %v339_v6, %v2135_v20  ;;  %vm436_vm8 = vcmp.eq.s32.totalorder %v367_v7, %v2135_v20  ;;  %vm438_vm9 = vcmp.eq.s32.totalorder %v2111_v8, %v2135_v20  ;;  %vm440_vm10 = vcmp.eq.s32.totalorder %v2114_v9, %v2135_v20 }
  0x6f   : > { %v801_v47 = vmul.f32 %v2181_v44, %v781_v43  ;;  %v803_v48 = vmul.f32 %v2181_v44, %v779_v42  ;;  %v861_v49 = vmul.f32 %v2181_v44, %v721_v41  ;;  %v863_v50 = vmul.f32 %v2181_v44, %v719_v40 }
  0x70   : > { %v2200_v51 = vrot.slane %v1017_v46, %v2128_v16  ;;  %v1497_v52 = vsel %vm378_vm6, 1.0, %v1899_v2  ;;  %v2204_v53 = vsel %vm380_vm7, 1.0, %v1899_v2  ;;  %v2207_v54 = vsel %vm436_vm8, 1.0, %v1899_v2 }
  0x71   : > { %v865_v55 = vadd.f32 %v801_v47, %v590_v36  ;;  %v867_v56 = vadd.f32 %v803_v48, %v592_v37  ;;  %v2209_v57 = vadd.f32 %v861_v49, %v650_v38  ;;  %v2211_v58 = vadd.f32 %v863_v50, %v652_v39 }
  0x72   : > { %v1557_v59 = vsel %vm438_vm9, 1.0, %v1899_v2  ;;  %v1559_v60 = vsel %vm440_vm10, 1.0, %v1899_v2  ;;  %v2215_v61 = vrot.slane %v574_v23, %v372_v10  ;;  %v653_v62 = vrot.slane %v1497_v52, 7 }
  0x73   : > { %v947_v63 = vmul.f32 %v2184_v45, %v865_v55  ;;  %v949_v0 = vmul.f32 %v2184_v45, %v867_v56  ;;  %v1029_v1 = vmul.f32 %v2200_v51, %v2209_v57  ;;  %v1031_v4 = vmul.f32 %v2200_v51, %v2211_v58 }
  0x74   : > { %v589_v6 = vmul.f32 %v1497_v52, %v2215_v61  ;;  %v591_v7 = vmul.f32 %v2204_v53, %v2215_v61  ;;  %v649_v8 = vmul.f32 %v1557_v59, %v2215_v61  ;;  %v651_v9 = vmul.f32 %v1559_v60, %v2215_v61 }
  0x75   : > { %v1093_v10 = vadd.f32 %v1029_v1, %v947_v63  ;;  %v1095_v12 = vadd.f32 %v1031_v4, %v949_v0  ;;  %v655_v13 = vrot.slane %v2204_v53, 7  ;;  %v711_v15 = vrot.slane %v2207_v54, 7 }
  0x76   : > { %v713_v18 = vrot.slane %v1557_v59, 7  ;;  %v715_v19 = vrot.slane %v1559_v60, 7  ;;  %v2234_v21 = vrot.slane %v785_v24, %v2118_v11  ;;  %v931_v22 = vrot.slane %v2106_v5, %v2124_v14 }
  0x77   : > { %v1572_v23 = vpack.c.bf16 %v1095_v12, %v1093_v10  ;;  %v778_v25 = vsel %vm717_vm0, %v653_v62, %v655_v13  ;;  %v1013_v28 = vrot.slane %v2106_v5, %v2128_v16  ;;  %v340_v29 = vadd.s32 16, %v2104_v3 }
  0x78   : > { %v718_v31 = vsel %vm717_vm0, %v713_v18, %v715_v19  ;;  %v720_v11 = vsel %vm717_vm0, %v711_v15, %v713_v18  ;;  %v780_v24 = vsel %vm717_vm0, %v715_v19, %v653_v62  ;;  %v802_v34 = vmul.f32 %v2234_v21, %v778_v25 }
  0x79   : > { %1573 = vmatprep.subr.bf16.mxu0 %v1572_v23  ;;  %v800_v35 = vmul.f32 %v2234_v21, %v780_v24  ;;  %v860_v5 = vmul.f32 %v2234_v21, %v720_v11  ;;  %v862_v36 = vmul.f32 %v2234_v21, %v718_v31  ;;  %v2256_v37 = vrot.slane %v931_v22, %v2124_v14 }
  0x7a   : > { %v866_v38 = vadd.f32 %v802_v34, %v591_v7  ;;  %v2259_v39 = vrot.slane %v1013_v28, %v2128_v16  ;;  %v341_v40 = vadd.s32 24, %v2104_v3  ;;  %vm383_vm11 = vcmp.eq.s32.totalorder %v340_v29, %v2131_v17 }
  0x7b   : > { %v864_v41 = vadd.f32 %v800_v35, %v589_v6  ;;  %v2263_v42 = vadd.f32 %v860_v5, %v649_v8  ;;  %v2265_v43 = vadd.f32 %v862_v36, %v651_v9  ;;  %v1502_v46 = vsel %vm383_vm11, 1.0, %v1899_v2 }
  0x7c   : > { %v948_v47 = vmul.f32 %v2256_v37, %v866_v38  ;;  %vm385_vm12 = vcmp.eq.s32.totalorder %v341_v40, %v2131_v17  ;;  %v594_v14 = vmul.f32 %v1502_v46, %v2159_v30  ;;  %v658_v48 = vrot.slane %v1502_v46, 7 }
  0x7d   : > { %v946_v16 = vmul.f32 %v2256_v37, %v864_v41  ;;  %v1028_v49 = vmul.f32 %v2259_v39, %v2263_v42  ;;  %v1030_v50 = vmul.f32 %v2259_v39, %v2265_v43  ;;  %v1504_v52 = vsel %vm385_vm12, 1.0, %v1899_v2 }
  0x7e   : > { %v596_v53 = vmul.f32 %v1504_v52, %v2159_v30  ;;  %v660_v59 = vrot.slane %v1504_v52, 7  ;;  %v777_v60 = vsel %vm717_vm0, %v656_v32, %v658_v48  ;;  %v1033_v1 = vmul.f32 %v2200_v51, %v865_v55 }
  0x7f   : > { %v1092_v62 = vadd.f32 %v1028_v49, %v946_v16  ;;  %v1094_v63 = vadd.f32 %v1030_v50, %v948_v47  ;;  %v805_v0 = vmul.f32 %v2181_v44, %v777_v60  ;;  %v1035_v6 = vmul.f32 %v2200_v51, %v867_v56 }
  0x80   : > { %v775_v4 = vsel %vm717_vm0, %v658_v48, %v660_v59  ;;  %vm382_vm13 = vcmp.eq.s32.totalorder %v340_v29, %v2135_v20  ;;  %vm384_vm14 = vcmp.eq.s32.totalorder %v341_v40, %v2135_v20  ;;  %v1032_v12 = vmul.f32 %v2259_v39, %v864_v41 }
  0x81   : > { %v1574_v7 = vpack.c.bf16 %v1094_v63, %v1092_v62  ;;  %v807_v26 = vmul.f32 %v2181_v44, %v775_v4  ;;  %v869_v8 = vadd.f32 %v805_v0, %v594_v14  ;;  %v1501_v32 = vsel %vm382_vm13, 1.0, %v1899_v2 }
  0x82   : > { %v1503_v9 = vsel %vm384_vm14, 1.0, %v1899_v2  ;;  %v593_v10 = vmul.f32 %v1501_v32, %v2215_v61  ;;  %v657_v55 = vrot.slane %v1501_v32, 7  ;;  %v1034_v22 = vmul.f32 %v2259_v39, %v866_v38 }
  0x83   : > { %1575 = vmatpush1.bf16.msra.mxu0 %v1574_v7  ;;  %v871_v18 = vadd.f32 %v807_v26, %v596_v53  ;;  %v951_v56 = vmul.f32 %v2184_v45, %v869_v8  ;;  %v659_v19 = vrot.slane %v1503_v9, 7  ;;  %v595_v23 = vmul.f32 %v1503_v9, %v2215_v61 }
  0x84   : > { %v776_v25 = vsel %vm717_vm0, %v655_v13, %v657_v55  ;;  %v342_v28 = vadd.s32 32, %v2104_v3  ;;  %v343_v29 = vadd.s32 40, %v2104_v3  ;;  %v1037_v13 = vmul.f32 %v2200_v51, %v869_v8 }
  0x85   : > { %v953_v31 = vmul.f32 %v2184_v45, %v871_v18  ;;  %v1097_v11 = vadd.f32 %v1033_v1, %v951_v56  ;;  %v774_v24 = vsel %vm717_vm0, %v657_v55, %v659_v19  ;;  %v804_v34 = vmul.f32 %v2234_v21, %v776_v25 }
  0x86   : > { %v806_v35 = vmul.f32 %v2234_v21, %v774_v24  ;;  %vm387_vm15 = vcmp.eq.s32.totalorder %v342_v28, %v2131_v17  ;;  %vm389_vm1 = vcmp.eq.s32.totalorder %v343_v29, %v2131_v17  ;;  %vm386_vm2 = vcmp.eq.s32.totalorder %v342_v28, %v2135_v20 }
  0x87   : > { %v1099_v5 = vadd.f32 %v1035_v6, %v953_v31  ;;  %v868_v36 = vadd.f32 %v804_v34, %v593_v10  ;;  %v1506_v38 = vsel %vm387_vm15, 1.0, %v1899_v2  ;;  %v1508_v40 = vsel %vm389_vm1, 1.0, %v1899_v2 }
  0x88   : > { %v870_v41 = vadd.f32 %v806_v35, %v595_v23  ;;  %v598_v46 = vmul.f32 %v1506_v38, %v2159_v30  ;;  %v600_v47 = vmul.f32 %v1508_v40, %v2159_v30  ;;  %v662_v14 = vrot.slane %v1506_v38, 7 }
  0x89   : > { %v1576_v48 = vpack.c.bf16 %v1099_v5, %v1097_v11  ;;  %v950_v16 = vmul.f32 %v2256_v37, %v868_v36  ;;  %v664_v49 = vrot.slane %v1508_v40, 7  ;;  %vm388_vm3 = vcmp.eq.s32.totalorder %v343_v29, %v2135_v20 }
  0x8a   : > { %v952_v50 = vmul.f32 %v2256_v37, %v870_v41  ;;  %v773_v52 = vsel %vm717_vm0, %v660_v59, %v662_v14  ;;  %v1505_v53 = vsel %vm386_vm2, 1.0, %v1899_v2  ;;  %v2324_v0 = vsel %vm388_vm3, 1.0, %v1899_v2 }
  0x8b   : > { %1577 = vmatprep.subr.bf16.mxu0 %v1576_v48  ;;  %v1096_v60 = vadd.f32 %v1032_v12, %v950_v16  ;;  %v771_v62 = vsel %vm717_vm0, %v662_v14, %v664_v49  ;;  %v809_v63 = vmul.f32 %v2181_v44, %v773_v52  ;;  %v1039_v6 = vmul.f32 %v2200_v51, %v871_v18 }
  0x8c   : > { %v1098_v1 = vadd.f32 %v1034_v22, %v952_v50  ;;  %v811_v4 = vmul.f32 %v2181_v44, %v771_v62  ;;  %v597_v59 = vmul.f32 %v1505_v53, %v2215_v61  ;;  %v599_v26 = vmul.f32 %v2324_v0, %v2215_v61 }
  0x8d   : > { %v873_v7 = vadd.f32 %v809_v63, %v598_v46  ;;  %v661_v8 = vrot.slane %v1505_v53, 7  ;;  %v663_v32 = vrot.slane %v2324_v0, 7  ;;  %v1036_v55 = vmul.f32 %v2259_v39, %v868_v36 }
  0x8e   : > { %v1578_v9 = vpack.c.bf16 %v1098_v1, %v1096_v60  ;;  %v875_v10 = vadd.f32 %v811_v4, %v600_v47  ;;  %v344_v12 = vadd.s32 48, %v2104_v3  ;;  %v345_v23 = vadd.s32 56, %v2104_v3 }
  0x8f   : > { %v955_v56 = vmul.f32 %v2184_v45, %v873_v7  ;;  %v770_v18 = vsel %vm717_vm0, %v661_v8, %v663_v32  ;;  %v772_v22 = vsel %vm717_vm0, %v659_v19, %v661_v8  ;;  %v1038_v11 = vmul.f32 %v2259_v39, %v870_v41 }
  0x90   : > { %1579 = vmatpush1.bf16.msra.mxu0 %v1578_v9  ;;  %v957_v25 = vmul.f32 %v2184_v45, %v875_v10  ;;  %v808_v28 = vmul.f32 %v2234_v21, %v772_v22  ;;  %v810_v29 = vmul.f32 %v2234_v21, %v770_v18  ;;  %vm391_vm4 = vcmp.eq.s32.totalorder %v344_v12, %v2131_v17 }
  0x91   : > { %v1101_v31 = vadd.f32 %v1037_v13, %v955_v56  ;;  %vm393_vm5 = vcmp.eq.s32.totalorder %v345_v23, %v2131_v17  ;;  %v1510_v24 = vsel %vm391_vm4, 1.0, %v1899_v2  ;;  %v1041_v46 = vmul.f32 %v2200_v51, %v873_v7 }
  0x92   : > { %v1103_v34 = vadd.f32 %v1039_v6, %v957_v25  ;;  %v872_v19 = vadd.f32 %v808_v28, %v597_v59  ;;  %v874_v35 = vadd.f32 %v810_v29, %v599_v26  ;;  %v2348_v5 = vsel %vm393_vm5, 1.0, %v1899_v2 }
  0x93   : > { %v602_v36 = vmul.f32 %v1510_v24, %v2159_v30  ;;  %v666_v38 = vrot.slane %v1510_v24, 7  ;;  %v668_v40 = vrot.slane %v2348_v5, 7  ;;  %v604_v14 = vmul.f32 %v2348_v5, %v2159_v30 }
  0x94   : > { %v1580_v13 = vpack.c.bf16 %v1103_v34, %v1101_v31  ;;  %v954_v41 = vmul.f32 %v2256_v37, %v872_v19  ;;  %v956_v47 = vmul.f32 %v2256_v37, %v874_v35  ;;  %vm390_vm6 = vcmp.eq.s32.totalorder %v344_v12, %v2135_v20 }
  0x95   : > { %v767_v48 = vsel %vm717_vm0, %v666_v38, %v668_v40  ;;  %v769_v16 = vsel %vm717_vm0, %v664_v49, %v666_v38  ;;  %vm392_vm7 = vcmp.eq.s32.totalorder %v345_v23, %v2135_v20  ;;  %v1043_v62 = vmul.f32 %v2200_v51, %v875_v10 }
  0x96   : > { %1581 = vmatprep.subr.bf16.mxu0 %v1580_v13  ;;  %v1100_v50 = vadd.f32 %v1036_v55, %v954_v41  ;;  %v1102_v52 = vadd.f32 %v1038_v11, %v956_v47  ;;  %v813_v53 = vmul.f32 %v2181_v44, %v769_v16  ;;  %v815_v60 = vmul.f32 %v2181_v44, %v767_v48 }
  0x97   : > { %v1509_v63 = vsel %vm390_vm6, 1.0, %v1899_v2  ;;  %v1511_v0 = vsel %vm392_vm7, 1.0, %v1899_v2  ;;  %v1040_v1 = vmul.f32 %v2259_v39, %v872_v19  ;;  %v1042_v59 = vmul.f32 %v2259_v39, %v874_v35 }
  0x98   : > { %v1582_v49 = vpack.c.bf16 %v1102_v52, %v1100_v50  ;;  %v877_v4 = vadd.f32 %v813_v53, %v602_v36  ;;  %v879_v6 = vadd.f32 %v815_v60, %v604_v14  ;;  %v601_v7 = vmul.f32 %v1509_v63, %v2215_v61 }
  0x99   : > { %v665_v26 = vrot.slane %v1509_v63, 7  ;;  %v667_v8 = vrot.slane %v1511_v0, 7  ;;  %v346_v9 = vadd.s32 64, %v2104_v3  ;;  %v603_v12 = vmul.f32 %v1511_v0, %v2215_v61 }
  0x9a   : > { %1583 = vmatpush1.bf16.msra.mxu0 %v1582_v49  ;;  %v959_v10 = vmul.f32 %v2184_v45, %v877_v4  ;;  %v961_v55 = vmul.f32 %v2184_v45, %v879_v6  ;;  %v347_v56 = vadd.s32 72, %v2104_v3  ;;  %v1045_v23 = vmul.f32 %v2200_v51, %v877_v4 }
  0x9b   : > { %v766_v18 = vsel %vm717_vm0, %v665_v26, %v667_v8  ;;  %v768_v22 = vsel %vm717_vm0, %v663_v32, %v665_v26  ;;  %vm395_vm8 = vcmp.eq.s32.totalorder %v346_v9, %v2131_v17  ;;  %vm394_vm10 = vcmp.eq.s32.totalorder %v346_v9, %v2135_v20 }
  0x9c   : > { %v1105_v25 = vadd.f32 %v1041_v46, %v959_v10  ;;  %v1107_v28 = vadd.f32 %v1043_v62, %v961_v55  ;;  %v812_v29 = vmul.f32 %v2234_v21, %v768_v22  ;;  %v814_v31 = vmul.f32 %v2234_v21, %v766_v18 }
  0x9d   : > { %vm397_vm9 = vcmp.eq.s32.totalorder %v347_v56, %v2131_v17  ;;  %v1514_v11 = vsel %vm395_vm8, 1.0, %v1899_v2  ;;  %vm396_vm11 = vcmp.eq.s32.totalorder %v347_v56, %v2135_v20  ;;  %v1513_v41 = vsel %vm394_vm10, 1.0, %v1899_v2 }
  0x9e   : > { %v1584_v24 = vpack.c.bf16 %v1107_v28, %v1105_v25  ;;  %v876_v32 = vadd.f32 %v812_v29, %v601_v7  ;;  %v878_v34 = vadd.f32 %v814_v31, %v603_v12  ;;  %v2389_v19 = vsel %vm397_vm9, 1.0, %v1899_v2 }
  0x9f   : > { %v606_v35 = vmul.f32 %v1514_v11, %v2159_v30  ;;  %v608_v5 = vmul.f32 %v2389_v19, %v2159_v30  ;;  %v670_v36 = vrot.slane %v1514_v11, 7  ;;  %v672_v38 = vrot.slane %v2389_v19, 7 }
  0xa0   : > { %1585 = vmatprep.subr.bf16.mxu0 %v1584_v24  ;;  %v958_v46 = vmul.f32 %v2256_v37, %v876_v32  ;;  %v960_v13 = vmul.f32 %v2256_v37, %v878_v34  ;;  %v1515_v47 = vsel %vm396_vm11, 1.0, %v1899_v2  ;;  %v1047_v16 = vmul.f32 %v2200_v51, %v879_v6 }
  0xa1   : > { %v763_v14 = vsel %vm717_vm0, %v670_v36, %v672_v38  ;;  %v765_v48 = vsel %vm717_vm0, %v668_v40, %v670_v36  ;;  %v605_v50 = vmul.f32 %v1513_v41, %v2215_v61  ;;  %v607_v63 = vmul.f32 %v1515_v47, %v2215_v61 }
  0xa2   : > { %v1104_v52 = vadd.f32 %v1040_v1, %v958_v46  ;;  %v1106_v53 = vadd.f32 %v1042_v59, %v960_v13  ;;  %v817_v60 = vmul.f32 %v2181_v44, %v765_v48  ;;  %v819_v62 = vmul.f32 %v2181_v44, %v763_v14 }
  0xa3   : > { %v669_v0 = vrot.slane %v1513_v41, 7  ;;  %v671_v49 = vrot.slane %v1515_v47, 7  ;;  %v1044_v4 = vmul.f32 %v2259_v39, %v876_v32  ;;  %v348_v40 = vadd.s32 80, %v2104_v3 }
  0xa4   : > { %v1586_v7 = vpack.c.bf16 %v1106_v53, %v1104_v52  ;;  %v881_v26 = vadd.f32 %v817_v60, %v606_v35  ;;  %v883_v9 = vadd.f32 %v819_v62, %v608_v5  ;;  %v1046_v59 = vmul.f32 %v2259_v39, %v878_v34 }
  0xa5   : > { %v762_v6 = vsel %vm717_vm0, %v669_v0, %v671_v49  ;;  %v764_v1 = vsel %vm717_vm0, %v667_v8, %v669_v0  ;;  %v349_v10 = vadd.s32 88, %v2104_v3  ;;  %vm399_vm12 = vcmp.eq.s32.totalorder %v348_v40, %v2131_v17 }
  0xa6   : > { %1587 = vmatpush1.bf16.msra.mxu0 %v1586_v7  ;;  %v963_v55 = vmul.f32 %v2184_v45, %v881_v26  ;;  %v965_v12 = vmul.f32 %v2184_v45, %v883_v9  ;;  %v816_v56 = vmul.f32 %v2234_v21, %v764_v1  ;;  %v818_v18 = vmul.f32 %v2234_v21, %v762_v6 }
  0xa7   : > { %vm401_vm13 = vcmp.eq.s32.totalorder %v349_v10, %v2131_v17  ;;  %v1049_v22 = vmul.f32 %v2200_v51, %v881_v26  ;;  %v2424_v8 = vadd.s32 96, %v2104_v3  ;;  %v1518_v11 = vsel %vm399_vm12, 1.0, %v1899_v2 }
  0xa8   : > { %v1109_v25 = vadd.f32 %v1045_v23, %v963_v55  ;;  %v1111_v28 = vadd.f32 %v1047_v16, %v965_v12  ;;  %v880_v29 = vadd.f32 %v816_v56, %v605_v50  ;;  %v882_v31 = vadd.f32 %v818_v18, %v607_v63 }
  0xa9   : > { %v1520_v24 = vsel %vm401_vm13, 1.0, %v1899_v2  ;;  %vm398_vm14 = vcmp.eq.s32.totalorder %v348_v40, %v2135_v20  ;;  %vm400_vm15 = vcmp.eq.s32.totalorder %v349_v10, %v2135_v20  ;;  %v1051_v35 = vmul.f32 %v2200_v51, %v883_v9 }
  0xaa   : > { %v1588_v32 = vpack.c.bf16 %v1111_v28, %v1109_v25  ;;  %v962_v34 = vmul.f32 %v2256_v37, %v880_v29  ;;  %v964_v19 = vmul.f32 %v2256_v37, %v882_v31  ;;  %v610_v23 = vmul.f32 %v1518_v11, %v2159_v30 }
  0xab   : > { %v674_v5 = vrot.slane %v1518_v11, 7  ;;  %v676_v36 = vrot.slane %v1520_v24, 7  ;;  %v1517_v46 = vsel %vm398_vm14, 1.0, %v1899_v2  ;;  %v612_v47 = vmul.f32 %v1520_v24, %v2159_v30 }
  0xac   : > { %1589 = vmatprep.subr.bf16.mxu0 %v1588_v32  ;;  %v1108_v13 = vadd.f32 %v1044_v4, %v962_v34  ;;  %v1110_v41 = vadd.f32 %v1046_v59, %v964_v19  ;;  %v2437_v14 = vsel %vm400_vm15, 1.0, %v1899_v2  ;;  %v609_v50 = vmul.f32 %v1517_v46, %v2215_v61 }
  0xad   : > { %v759_v48 = vsel %vm717_vm0, %v674_v5, %v676_v36  ;;  %v761_v16 = vsel %vm717_vm0, %v672_v38, %v674_v5  ;;  %v673_v52 = vrot.slane %v1517_v46, 7  ;;  %v675_v63 = vrot.slane %v2437_v14, 7 }
  0xae   : > { %v1590_v53 = vpack.c.bf16 %v1110_v41, %v1108_v13  ;;  %v821_v60 = vmul.f32 %v2181_v44, %v761_v16  ;;  %v823_v62 = vmul.f32 %v2181_v44, %v759_v48  ;;  %v611_v0 = vmul.f32 %v2437_v14, %v2215_v61 }
  0xaf   : > { %v760_v4 = vsel %vm717_vm0, %v671_v49, %v673_v52  ;;  %v1048_v7 = vmul.f32 %v2259_v39, %v880_v29  ;;  %v351_v38 = vadd.s32 104, %v2104_v3  ;;  %v758_v40 = vsel %vm717_vm0, %v673_v52, %v675_v63 }
  0xb0   : > { %1591 = vmatpush1.bf16.msra.mxu0 %v1590_v53  ;;  %v885_v26 = vadd.f32 %v821_v60, %v610_v23  ;;  %v887_v9 = vadd.f32 %v823_v62, %v612_v47  ;;  %v820_v6 = vmul.f32 %v2234_v21, %v760_v4  ;;  %v822_v1 = vmul.f32 %v2234_v21, %v758_v40 }
  0xb1   : > { %v1050_v59 = vmul.f32 %v2259_v39, %v882_v31  ;;  %vm403_vm1 = vcmp.eq.s32.totalorder %v2424_v8, %v2131_v17  ;;  %vm405_vm2 = vcmp.eq.s32.totalorder %v351_v38, %v2131_v17  ;;  %vm402_vm3 = vcmp.eq.s32.totalorder %v2424_v8, %v2135_v20 }
  0xb2   : > { %v967_v49 = vmul.f32 %v2184_v45, %v885_v26  ;;  %v969_v10 = vmul.f32 %v2184_v45, %v887_v9  ;;  %v884_v55 = vadd.f32 %v820_v6, %v609_v50  ;;  %v1522_v12 = vsel %vm403_vm1, 1.0, %v1899_v2 }
  0xb3   : > { %v886_v56 = vadd.f32 %v822_v1, %v611_v0  ;;  %v1524_v18 = vsel %vm405_vm2, 1.0, %v1899_v2  ;;  %v678_v25 = vrot.slane %v1522_v12, 7  ;;  %v614_v11 = vmul.f32 %v1522_v12, %v2159_v30 }
  0xb4   : > { %v1113_v28 = vadd.f32 %v1049_v22, %v967_v49  ;;  %v1115_v29 = vadd.f32 %v1051_v35, %v969_v10  ;;  %v966_v31 = vmul.f32 %v2256_v37, %v884_v55  ;;  %v616_v32 = vmul.f32 %v1524_v18, %v2159_v30 }
  0xb5   : > { %v968_v24 = vmul.f32 %v2256_v37, %v886_v56  ;;  %v680_v34 = vrot.slane %v1524_v18, 7  ;;  %v757_v19 = vsel %vm717_vm0, %v676_v36, %v678_v25  ;;  %v1053_v13 = vmul.f32 %v2200_v51, %v885_v26 }
  0xb6   : > { %v1592_v23 = vpack.c.bf16 %v1115_v29, %v1113_v28  ;;  %v1112_v5 = vadd.f32 %v1048_v7, %v966_v31  ;;  %v825_v46 = vmul.f32 %v2181_v44, %v757_v19  ;;  %vm404_vm4 = vcmp.eq.s32.totalorder %v351_v38, %v2135_v20 }
  0xb7   : > { %v1114_v22 = vadd.f32 %v1050_v59, %v968_v24  ;;  %v755_v35 = vsel %vm717_vm0, %v678_v25, %v680_v34  ;;  %v1521_v41 = vsel %vm402_vm3, 1.0, %v1899_v2  ;;  %v1055_v14 = vmul.f32 %v2200_v51, %v887_v9 }
  0xb8   : > { %1593 = vmatprep.subr.bf16.mxu0 %v1592_v23  ;;  %v827_v36 = vmul.f32 %v2181_v44, %v755_v35  ;;  %v889_v47 = vadd.f32 %v825_v46, %v614_v11  ;;  %v1523_v48 = vsel %vm404_vm4, 1.0, %v1899_v2  ;;  %v613_v50 = vmul.f32 %v1521_v41, %v2215_v61 }
  0xb9   : > { %v1594_v16 = vpack.c.bf16 %v1114_v22, %v1112_v5  ;;  %v677_v52 = vrot.slane %v1521_v41, 7  ;;  %v679_v53 = vrot.slane %v1523_v48, 7  ;;  %v615_v0 = vmul.f32 %v1523_v48, %v2215_v61 }
  0xba   : > { %v891_v60 = vadd.f32 %v827_v36, %v616_v32  ;;  %v971_v62 = vmul.f32 %v2184_v45, %v889_v47  ;;  %v1052_v8 = vmul.f32 %v2259_v39, %v884_v55  ;;  %v352_v38 = vadd.s32 112, %v2104_v3 }
  0xbb   : > { %1595 = vmatpush1.bf16.msra.mxu0 %v1594_v16  ;;  %v754_v4 = vsel %vm717_vm0, %v677_v52, %v679_v53  ;;  %v756_v7 = vsel %vm717_vm0, %v675_v63, %v677_v52  ;;  %v353_v26 = vadd.s32 120, %v2104_v3  ;;  %v1054_v59 = vmul.f32 %v2259_v39, %v886_v56 }
  0xbc   : > { %v973_v9 = vmul.f32 %v2184_v45, %v891_v60  ;;  %v1117_v40 = vadd.f32 %v1053_v13, %v971_v62  ;;  %v824_v6 = vmul.f32 %v2234_v21, %v756_v7  ;;  %v826_v1 = vmul.f32 %v2234_v21, %v754_v4 }
  0xbd   : > { %vm407_vm5 = vcmp.eq.s32.totalorder %v352_v38, %v2131_v17  ;;  %vm409_vm6 = vcmp.eq.s32.totalorder %v353_v26, %v2131_v17  ;;  %v1057_v49 = vmul.f32 %v2200_v51, %v889_v47  ;;  %vm406_vm7 = vcmp.eq.s32.totalorder %v352_v38, %v2135_v20 }
  0xbe   : > { %v1119_v63 = vadd.f32 %v1055_v14, %v973_v9  ;;  %v888_v10 = vadd.f32 %v824_v6, %v613_v50  ;;  %v890_v55 = vadd.f32 %v826_v1, %v615_v0  ;;  %v1526_v12 = vsel %vm407_vm5, 1.0, %v1899_v2 }
  0xbf   : > { %v1528_v18 = vsel %vm409_vm6, 1.0, %v1899_v2  ;;  %v618_v25 = vmul.f32 %v1526_v12, %v2159_v30  ;;  %v682_v28 = vrot.slane %v1526_v12, 7  ;;  %vm408_vm8 = vcmp.eq.s32.totalorder %v353_v26, %v2135_v20 }
  0xc0   : > { %v1596_v29 = vpack.c.bf16 %v1119_v63, %v1117_v40  ;;  %v970_v56 = vmul.f32 %v2256_v37, %v888_v10  ;;  %v972_v31 = vmul.f32 %v2256_v37, %v890_v55  ;;  %v620_v11 = vmul.f32 %v1528_v18, %v2159_v30 }
  0xc1   : > { %v684_v24 = vrot.slane %v1528_v18, 7  ;;  %v753_v32 = vsel %vm717_vm0, %v680_v34, %v682_v28  ;;  %v1525_v19 = vsel %vm406_vm7, 1.0, %v1899_v2  ;;  %v2515_v13 = vsel %vm408_vm8, 1.0, %v1899_v2 }
  0xc2   : > { %1597 = vmatprep.subr.bf16.mxu0 %v1596_v29  ;;  %v1116_v23 = vadd.f32 %v1052_v8, %v970_v56  ;;  %v1118_v5 = vadd.f32 %v1054_v59, %v972_v31  ;;  %v829_v46 = vmul.f32 %v2181_v44, %v753_v32  ;;  %v1059_v35 = vmul.f32 %v2200_v51, %v891_v60 }
  0xc3   : > { %v751_v22 = vsel %vm717_vm0, %v682_v28, %v684_v24  ;;  %v617_v41 = vmul.f32 %v1525_v19, %v2215_v61  ;;  %v681_v34 = vrot.slane %v1525_v19, 7  ;;  %v683_v48 = vrot.slane %v2515_v13, 7 }
  0xc4   : > { %v1598_v36 = vpack.c.bf16 %v1118_v5, %v1116_v23  ;;  %v831_v47 = vmul.f32 %v2181_v44, %v751_v22  ;;  %v893_v14 = vadd.f32 %v829_v46, %v618_v25  ;;  %v619_v16 = vmul.f32 %v2515_v13, %v2215_v61 }
  0xc5   : > { %v752_v50 = vsel %vm717_vm0, %v679_v53, %v681_v34  ;;  %v1056_v52 = vmul.f32 %v2259_v39, %v888_v10  ;;  %v354_v62 = vadd.s32 128, %v2104_v3  ;;  %v750_v8 = vsel %vm717_vm0, %v681_v34, %v683_v48 }
  0xc6   : > { %1599 = vmatpush1.bf16.msra.mxu0 %v1598_v36  ;;  %v895_v60 = vadd.f32 %v831_v47, %v620_v11  ;;  %v975_v0 = vmul.f32 %v2184_v45, %v893_v14  ;;  %v828_v4 = vmul.f32 %v2234_v21, %v752_v50  ;;  %v830_v7 = vmul.f32 %v2234_v21, %v750_v8 }
  0xc7   : > { %v1058_v38 = vmul.f32 %v2259_v39, %v890_v55  ;;  %v355_v26 = vadd.s32 136, %v2104_v3  ;;  %vm411_vm9 = vcmp.eq.s32.totalorder %v354_v62, %v2131_v17  ;;  %v1061_v63 = vmul.f32 %v2200_v51, %v893_v14 }
  0xc8   : > { %v977_v53 = vmul.f32 %v2184_v45, %v895_v60  ;;  %v1121_v9 = vadd.f32 %v1057_v49, %v975_v0  ;;  %v892_v40 = vadd.f32 %v828_v4, %v617_v41  ;;  %v1530_v6 = vsel %vm411_vm9, 1.0, %v1899_v2 }
  0xc9   : > { %v894_v1 = vadd.f32 %v830_v7, %v619_v16  ;;  %vm413_vm10 = vcmp.eq.s32.totalorder %v355_v26, %v2131_v17  ;;  %v686_v59 = vrot.slane %v1530_v6, 7  ;;  %v622_v18 = vmul.f32 %v1530_v6, %v2159_v30 }
  0xca   : > { %v1123_v10 = vadd.f32 %v1059_v35, %v977_v53  ;;  %v974_v12 = vmul.f32 %v2256_v37, %v892_v40  ;;  %v1532_v55 = vsel %vm413_vm10, 1.0, %v1899_v2  ;;  %vm410_vm11 = vcmp.eq.s32.totalorder %v354_v62, %v2135_v20 }
  0xcb   : > { %v976_v25 = vmul.f32 %v2256_v37, %v894_v1  ;;  %v624_v49 = vmul.f32 %v1532_v55, %v2159_v30  ;;  %v688_v28 = vrot.slane %v1532_v55, 7  ;;  %v749_v29 = vsel %vm717_vm0, %v684_v24, %v686_v59 }
  0xcc   : > { %v1600_v56 = vpack.c.bf16 %v1123_v10, %v1121_v9  ;;  %v1120_v31 = vadd.f32 %v1056_v52, %v974_v12  ;;  %v833_v11 = vmul.f32 %v2181_v44, %v749_v29  ;;  %vm412_vm12 = vcmp.eq.s32.totalorder %v355_v26, %v2135_v20 }
  0xcd   : > { %v1122_v32 = vadd.f32 %v1058_v38, %v976_v25  ;;  %v747_v19 = vsel %vm717_vm0, %v686_v59, %v688_v28  ;;  %v1529_v23 = vsel %vm410_vm11, 1.0, %v1899_v2  ;;  %v1063_v24 = vmul.f32 %v2200_v51, %v895_v60 }
  0xce   : > { %1601 = vmatprep.subr.bf16.mxu0 %v1600_v56  ;;  %v835_v5 = vmul.f32 %v2181_v44, %v747_v19  ;;  %v897_v46 = vadd.f32 %v833_v11, %v622_v18  ;;  %v1531_v13 = vsel %vm412_vm12, 1.0, %v1899_v2  ;;  %v621_v35 = vmul.f32 %v1529_v23, %v2215_v61 }
  0xcf   : > { %v1602_v22 = vpack.c.bf16 %v1122_v32, %v1120_v31  ;;  %v685_v41 = vrot.slane %v1529_v23, 7  ;;  %v687_v34 = vrot.slane %v1531_v13, 7  ;;  %v623_v14 = vmul.f32 %v1531_v13, %v2215_v61 }
  0xd0   : > { %v899_v36 = vadd.f32 %v835_v5, %v624_v49  ;;  %v979_v47 = vmul.f32 %v2184_v45, %v897_v46  ;;  %v1060_v16 = vmul.f32 %v2259_v39, %v892_v40  ;;  %v356_v62 = vadd.s32 144, %v2104_v3 }
  0xd1   : > { %1603 = vmatpush1.bf16.msra.mxu0 %v1602_v22  ;;  %v746_v50 = vsel %vm717_vm0, %v685_v41, %v687_v34  ;;  %v748_v52 = vsel %vm717_vm0, %v683_v48, %v685_v41  ;;  %v357_v60 = vadd.s32 152, %v2104_v3  ;;  %v1062_v38 = vmul.f32 %v2259_v39, %v894_v1 }
  0xd2   : > { %v981_v0 = vmul.f32 %v2184_v45, %v899_v36  ;;  %v1125_v8 = vadd.f32 %v1061_v63, %v979_v47  ;;  %v832_v4 = vmul.f32 %v2234_v21, %v748_v52  ;;  %v834_v7 = vmul.f32 %v2234_v21, %v746_v50 }
  0xd3   : > { %vm415_vm13 = vcmp.eq.s32.totalorder %v356_v62, %v2131_v17  ;;  %vm417_vm14 = vcmp.eq.s32.totalorder %v357_v60, %v2131_v17  ;;  %v1065_v26 = vmul.f32 %v2200_v51, %v897_v46  ;;  %vm414_vm15 = vcmp.eq.s32.totalorder %v356_v62, %v2135_v20 }
  0xd4   : > { %v1127_v48 = vadd.f32 %v1063_v24, %v981_v0  ;;  %v896_v53 = vadd.f32 %v832_v4, %v621_v35  ;;  %v898_v9 = vadd.f32 %v834_v7, %v623_v14  ;;  %v1534_v40 = vsel %vm415_vm13, 1.0, %v1899_v2 }
  0xd5   : > { %v1536_v6 = vsel %vm417_vm14, 1.0, %v1899_v2  ;;  %v626_v59 = vmul.f32 %v1534_v40, %v2159_v30  ;;  %v690_v63 = vrot.slane %v1534_v40, 7  ;;  %vm416_vm1 = vcmp.eq.s32.totalorder %v357_v60, %v2135_v20 }
  0xd6   : > { %v1604_v10 = vpack.c.bf16 %v1127_v48, %v1125_v8  ;;  %v978_v1 = vmul.f32 %v2256_v37, %v896_v53  ;;  %v980_v12 = vmul.f32 %v2256_v37, %v898_v9  ;;  %v628_v55 = vmul.f32 %v1536_v6, %v2159_v30 }
  0xd7   : > { %v692_v18 = vrot.slane %v1536_v6, 7  ;;  %v745_v25 = vsel %vm717_vm0, %v688_v28, %v690_v63  ;;  %v1533_v49 = vsel %vm414_vm15, 1.0, %v1899_v2  ;;  %v2587_v11 = vsel %vm416_vm1, 1.0, %v1899_v2 }
  0xd8   : > { %1605 = vmatprep.subr.bf16.mxu0 %v1604_v10  ;;  %v1124_v29 = vadd.f32 %v1060_v16, %v978_v1  ;;  %v1126_v56 = vadd.f32 %v1062_v38, %v980_v12  ;;  %v837_v31 = vmul.f32 %v2181_v44, %v745_v25  ;;  %v1067_v19 = vmul.f32 %v2200_v51, %v899_v36 }
  0xd9   : > { %v743_v32 = vsel %vm717_vm0, %v690_v63, %v692_v18  ;;  %v625_v23 = vmul.f32 %v1533_v49, %v2215_v61  ;;  %v689_v28 = vrot.slane %v1533_v49, 7  ;;  %v691_v13 = vrot.slane %v2587_v11, 7 }
  0xda   : > { %v1606_v5 = vpack.c.bf16 %v1126_v56, %v1124_v29  ;;  %v839_v46 = vmul.f32 %v2181_v44, %v743_v32  ;;  %v901_v24 = vadd.f32 %v837_v31, %v626_v59  ;;  %v627_v22 = vmul.f32 %v2587_v11, %v2215_v61 }
  0xdb   : > { %v744_v35 = vsel %vm717_vm0, %v687_v34, %v689_v28  ;;  %v1064_v41 = vmul.f32 %v2259_v39, %v896_v53  ;;  %v358_v47 = vadd.s32 160, %v2104_v3  ;;  %v742_v16 = vsel %vm717_vm0, %v689_v28, %v691_v13 }
  0xdc   : > { %1607 = vmatpush1.bf16.msra.mxu0 %v1606_v5  ;;  %v903_v36 = vadd.f32 %v839_v46, %v628_v55  ;;  %v983_v14 = vmul.f32 %v2184_v45, %v901_v24  ;;  %v836_v50 = vmul.f32 %v2234_v21, %v744_v35  ;;  %v838_v52 = vmul.f32 %v2234_v21, %v742_v16 }
  0xdd   : > { %v1066_v62 = vmul.f32 %v2259_v39, %v898_v9  ;;  %v359_v60 = vadd.s32 168, %v2104_v3  ;;  %vm419_vm2 = vcmp.eq.s32.totalorder %v358_v47, %v2131_v17  ;;  %v1069_v48 = vmul.f32 %v2200_v51, %v901_v24 }
  0xde   : > { %v985_v34 = vmul.f32 %v2184_v45, %v903_v36  ;;  %v1129_v0 = vadd.f32 %v1065_v26, %v983_v14  ;;  %v900_v8 = vadd.f32 %v836_v50, %v625_v23  ;;  %v1538_v4 = vsel %vm419_vm2, 1.0, %v1899_v2 }
  0xdf   : > { %v902_v7 = vadd.f32 %v838_v52, %v627_v22  ;;  %vm421_vm3 = vcmp.eq.s32.totalorder %v359_v60, %v2131_v17  ;;  %v694_v38 = vrot.slane %v1538_v4, 7  ;;  %v630_v6 = vmul.f32 %v1538_v4, %v2159_v30 }
  0xe0   : > { %v1131_v53 = vadd.f32 %v1067_v19, %v985_v34  ;;  %v982_v40 = vmul.f32 %v2256_v37, %v900_v8  ;;  %v1540_v9 = vsel %vm421_vm3, 1.0, %v1899_v2  ;;  %vm418_vm4 = vcmp.eq.s32.totalorder %v358_v47, %v2135_v20 }
  0xe1   : > { %v984_v59 = vmul.f32 %v2256_v37, %v902_v7  ;;  %v632_v26 = vmul.f32 %v1540_v9, %v2159_v30  ;;  %v696_v63 = vrot.slane %v1540_v9, 7  ;;  %v741_v10 = vsel %vm717_vm0, %v692_v18, %v694_v38 }
  0xe2   : > { %v1608_v1 = vpack.c.bf16 %v1131_v53, %v1129_v0  ;;  %v1128_v12 = vadd.f32 %v1064_v41, %v982_v40  ;;  %v841_v55 = vmul.f32 %v2181_v44, %v741_v10  ;;  %vm420_vm5 = vcmp.eq.s32.totalorder %v359_v60, %v2135_v20 }
  0xe3   : > { %v1130_v25 = vadd.f32 %v1066_v62, %v984_v59  ;;  %v739_v49 = vsel %vm717_vm0, %v694_v38, %v696_v63  ;;  %v1537_v29 = vsel %vm418_vm4, 1.0, %v1899_v2  ;;  %v1071_v18 = vmul.f32 %v2200_v51, %v903_v36 }
  0xe4   : > { %1609 = vmatprep.subr.bf16.mxu0 %v1608_v1  ;;  %v843_v56 = vmul.f32 %v2181_v44, %v739_v49  ;;  %v905_v31 = vadd.f32 %v841_v55, %v630_v6  ;;  %v1539_v11 = vsel %vm420_vm5, 1.0, %v1899_v2  ;;  %v629_v19 = vmul.f32 %v1537_v29, %v2215_v61 }
  0xe5   : > { %v1610_v32 = vpack.c.bf16 %v1130_v25, %v1128_v12  ;;  %v693_v23 = vrot.slane %v1537_v29, 7  ;;  %v695_v28 = vrot.slane %v1539_v11, 7  ;;  %v631_v24 = vmul.f32 %v1539_v11, %v2215_v61 }
  0xe6   : > { %v907_v5 = vadd.f32 %v843_v56, %v632_v26  ;;  %v987_v46 = vmul.f32 %v2184_v45, %v905_v31  ;;  %v1068_v22 = vmul.f32 %v2259_v39, %v900_v8  ;;  %v360_v47 = vadd.s32 176, %v2104_v3 }
  0xe7   : > { %1611 = vmatpush1.bf16.msra.mxu0 %v1610_v32  ;;  %v738_v35 = vsel %vm717_vm0, %v693_v23, %v695_v28  ;;  %v740_v41 = vsel %vm717_vm0, %v691_v13, %v693_v23  ;;  %v361_v36 = vadd.s32 184, %v2104_v3  ;;  %v1070_v62 = vmul.f32 %v2259_v39, %v902_v7 }
  0xe8   : > { %v989_v14 = vmul.f32 %v2184_v45, %v907_v5  ;;  %v1133_v16 = vadd.f32 %v1069_v48, %v987_v46  ;;  %v840_v50 = vmul.f32 %v2234_v21, %v740_v41  ;;  %v842_v52 = vmul.f32 %v2234_v21, %v738_v35 }
  0xe9   : > { %vm423_vm6 = vcmp.eq.s32.totalorder %v360_v47, %v2131_v17  ;;  %vm425_vm7 = vcmp.eq.s32.totalorder %v361_v36, %v2131_v17  ;;  %v1073_v60 = vmul.f32 %v2200_v51, %v905_v31  ;;  %vm422_vm8 = vcmp.eq.s32.totalorder %v360_v47, %v2135_v20 }
  0xea   : > { %v1135_v13 = vadd.f32 %v1071_v18, %v989_v14  ;;  %v904_v34 = vadd.f32 %v840_v50, %v629_v19  ;;  %v906_v0 = vadd.f32 %v842_v52, %v631_v24  ;;  %v1542_v8 = vsel %vm423_vm6, 1.0, %v1899_v2 }
  0xeb   : > { %v1544_v4 = vsel %vm425_vm7, 1.0, %v1899_v2  ;;  %v634_v38 = vmul.f32 %v1542_v8, %v2159_v30  ;;  %v698_v48 = vrot.slane %v1542_v8, 7  ;;  %vm424_vm9 = vcmp.eq.s32.totalorder %v361_v36, %v2135_v20 }
  0xec   : > { %v1612_v53 = vpack.c.bf16 %v1135_v13, %v1133_v16  ;;  %v986_v7 = vmul.f32 %v2256_v37, %v904_v34  ;;  %v988_v40 = vmul.f32 %v2256_v37, %v906_v0  ;;  %v636_v9 = vmul.f32 %v1544_v4, %v2159_v30 }
  0xed   : > { %v700_v6 = vrot.slane %v1544_v4, 7  ;;  %v737_v59 = vsel %vm717_vm0, %v696_v63, %v698_v48  ;;  %v1541_v26 = vsel %vm422_vm8, 1.0, %v1899_v2  ;;  %v2659_v55 = vsel %vm424_vm9, 1.0, %v1899_v2 }
  0xee   : > { %1613 = vmatprep.subr.bf16.mxu0 %v1612_v53  ;;  %v1132_v10 = vadd.f32 %v1068_v22, %v986_v7  ;;  %v1134_v1 = vadd.f32 %v1070_v62, %v988_v40  ;;  %v845_v12 = vmul.f32 %v2181_v44, %v737_v59  ;;  %v1075_v49 = vmul.f32 %v2200_v51, %v907_v5 }
  0xef   : > { %v735_v25 = vsel %vm717_vm0, %v698_v48, %v700_v6  ;;  %v633_v29 = vmul.f32 %v1541_v26, %v2215_v61  ;;  %v697_v63 = vrot.slane %v1541_v26, 7  ;;  %v699_v11 = vrot.slane %v2659_v55, 7 }
  0xf0   : > { %v1614_v56 = vpack.c.bf16 %v1134_v1, %v1132_v10  ;;  %v847_v31 = vmul.f32 %v2181_v44, %v735_v25  ;;  %v909_v18 = vadd.f32 %v845_v12, %v634_v38  ;;  %v635_v32 = vmul.f32 %v2659_v55, %v2215_v61 }
  0xf1   : > { %v736_v19 = vsel %vm717_vm0, %v695_v28, %v697_v63  ;;  %v1072_v23 = vmul.f32 %v2259_v39, %v904_v34  ;;  %v362_v46 = vadd.s32 192, %v2104_v3  ;;  %v734_v22 = vsel %vm717_vm0, %v697_v63, %v699_v11 }
  0xf2   : > { %1615 = vmatpush1.bf16.msra.mxu0 %v1614_v56  ;;  %v911_v5 = vadd.f32 %v847_v31, %v636_v9  ;;  %v991_v24 = vmul.f32 %v2184_v45, %v909_v18  ;;  %v844_v35 = vmul.f32 %v2234_v21, %v736_v19  ;;  %v846_v41 = vmul.f32 %v2234_v21, %v734_v22 }
  0xf3   : > { %v1074_v47 = vmul.f32 %v2259_v39, %v906_v0  ;;  %v363_v36 = vadd.s32 200, %v2104_v3  ;;  %vm427_vm10 = vcmp.eq.s32.totalorder %v362_v46, %v2131_v17  ;;  %v1077_v13 = vmul.f32 %v2200_v51, %v909_v18 }
  0xf4   : > { %v993_v28 = vmul.f32 %v2184_v45, %v911_v5  ;;  %v1137_v14 = vadd.f32 %v1073_v60, %v991_v24  ;;  %v908_v16 = vadd.f32 %v844_v35, %v633_v29  ;;  %v1546_v50 = vsel %vm427_vm10, 1.0, %v1899_v2 }
  0xf5   : > { %v910_v52 = vadd.f32 %v846_v41, %v635_v32  ;;  %vm429_vm11 = vcmp.eq.s32.totalorder %v363_v36, %v2131_v17  ;;  %v702_v62 = vrot.slane %v1546_v50, 7  ;;  %v638_v4 = vmul.f32 %v1546_v50, %v2159_v30 }
  0xf6   : > { %v1139_v34 = vadd.f32 %v1075_v49, %v993_v28  ;;  %v990_v8 = vmul.f32 %v2256_v37, %v908_v16  ;;  %v1548_v0 = vsel %vm429_vm11, 1.0, %v1899_v2  ;;  %vm426_vm12 = vcmp.eq.s32.totalorder %v362_v46, %v2135_v20 }
  0xf7   : > { %v992_v38 = vmul.f32 %v2256_v37, %v910_v52  ;;  %v640_v60 = vmul.f32 %v1548_v0, %v2159_v30  ;;  %v704_v48 = vrot.slane %v1548_v0, 7  ;;  %v733_v53 = vsel %vm717_vm0, %v700_v6, %v702_v62 }
  0xf8   : > { %v1616_v7 = vpack.c.bf16 %v1139_v34, %v1137_v14  ;;  %v1136_v40 = vadd.f32 %v1072_v23, %v990_v8  ;;  %v849_v9 = vmul.f32 %v2181_v44, %v733_v53  ;;  %vm428_vm13 = vcmp.eq.s32.totalorder %v363_v36, %v2135_v20 }
  0xf9   : > { %v1138_v59 = vadd.f32 %v1074_v47, %v992_v38  ;;  %v731_v26 = vsel %vm717_vm0, %v702_v62, %v704_v48  ;;  %v1545_v10 = vsel %vm426_vm12, 1.0, %v1899_v2  ;;  %v1079_v6 = vmul.f32 %v2200_v51, %v911_v5 }
  0xfa   : > { %1617 = vmatprep.subr.bf16.mxu0 %v1616_v7  ;;  %v851_v1 = vmul.f32 %v2181_v44, %v731_v26  ;;  %v913_v12 = vadd.f32 %v849_v9, %v638_v4  ;;  %v1547_v55 = vsel %vm428_vm13, 1.0, %v1899_v2  ;;  %v637_v49 = vmul.f32 %v1545_v10, %v2215_v61 }
  0xfb   : > { %v1618_v25 = vpack.c.bf16 %v1138_v59, %v1136_v40  ;;  %v701_v29 = vrot.slane %v1545_v10, 7  ;;  %v703_v63 = vrot.slane %v1547_v55, 7  ;;  %v639_v18 = vmul.f32 %v1547_v55, %v2215_v61 }
  0xfc   : > { %v915_v56 = vadd.f32 %v851_v1, %v640_v60  ;;  %v995_v31 = vmul.f32 %v2184_v45, %v913_v12  ;;  %v1076_v32 = vmul.f32 %v2259_v39, %v908_v16  ;;  %v364_v46 = vadd.s32 208, %v2104_v3 }
  0xfd   : > { %1619 = vmatpush1.bf16.msra.mxu0 %v1618_v25  ;;  %v730_v19 = vsel %vm717_vm0, %v701_v29, %v703_v63  ;;  %v732_v23 = vsel %vm717_vm0, %v699_v11, %v701_v29  ;;  %v365_v5 = vadd.s32 216, %v2104_v3  ;;  %v1078_v47 = vmul.f32 %v2259_v39, %v910_v52 }
  0xfe   : > { %v997_v24 = vmul.f32 %v2184_v45, %v915_v56  ;;  %v1141_v22 = vadd.f32 %v1077_v13, %v995_v31  ;;  %v848_v35 = vmul.f32 %v2234_v21, %v732_v23  ;;  %v850_v41 = vmul.f32 %v2234_v21, %v730_v19 }
  0xff   : > { %vm431_vm14 = vcmp.eq.s32.totalorder %v364_v46, %v2131_v17  ;;  %vm433_vm15 = vcmp.eq.s32.totalorder %v365_v5, %v2131_v17  ;;  %v1081_v36 = vmul.f32 %v2200_v51, %v913_v12  ;;  %vm430_vm1 = vcmp.eq.s32.totalorder %v364_v46, %v2135_v20 }
 0x100   : > { %v1143_v11 = vadd.f32 %v1079_v6, %v997_v24  ;;  %v912_v28 = vadd.f32 %v848_v35, %v637_v49  ;;  %v914_v14 = vadd.f32 %v850_v41, %v639_v18  ;;  %v1550_v16 = vsel %vm431_vm14, 1.0, %v1899_v2 }
 0x101   : > { %v1552_v50 = vsel %vm433_vm15, 1.0, %v1899_v2  ;;  %v642_v62 = vmul.f32 %v1550_v16, %v2159_v30  ;;  %v706_v13 = vrot.slane %v1550_v16, 7  ;;  %vm432_vm2 = vcmp.eq.s32.totalorder %v365_v5, %v2135_v20 }
 0x102   : > { %v1620_v34 = vpack.c.bf16 %v1143_v11, %v1141_v22  ;;  %v994_v52 = vmul.f32 %v2256_v37, %v912_v28  ;;  %v996_v8 = vmul.f32 %v2256_v37, %v914_v14  ;;  %v644_v0 = vmul.f32 %v1552_v50, %v2159_v30 }
 0x103   : > { %v708_v4 = vrot.slane %v1552_v50, 7  ;;  %v729_v38 = vsel %vm717_vm0, %v704_v48, %v706_v13  ;;  %v1549_v60 = vsel %vm430_vm1, 1.0, %v1899_v2  ;;  %v1551_v9 = vsel %vm432_vm2, 1.0, %v1899_v2 }
 0x104   : > { %1621 = vmatprep.subr.bf16.mxu0 %v1620_v34  ;;  %v1140_v53 = vadd.f32 %v1076_v32, %v994_v52  ;;  %v1142_v7 = vadd.f32 %v1078_v47, %v996_v8  ;;  %v853_v40 = vmul.f32 %v2181_v44, %v729_v38  ;;  %v1083_v26 = vmul.f32 %v2200_v51, %v915_v56 }
 0x105   : > { %v727_v59 = vsel %vm717_vm0, %v706_v13, %v708_v4  ;;  %v641_v10 = vmul.f32 %v1549_v60, %v2215_v61  ;;  %v705_v1 = vrot.slane %v1549_v60, 7  ;;  %v707_v55 = vrot.slane %v1551_v9, 7 }
 0x106   : > { %v1622_v48 = vpack.c.bf16 %v1142_v7, %v1140_v53  ;;  %v855_v12 = vmul.f32 %v2181_v44, %v727_v59  ;;  %v917_v6 = vadd.f32 %v853_v40, %v642_v62  ;;  %v643_v25 = vmul.f32 %v1551_v9, %v2215_v61 }
 0x107   : > { %v728_v49 = vsel %vm717_vm0, %v703_v63, %v705_v1  ;;  %v1080_v29 = vmul.f32 %v2259_v39, %v912_v28  ;;  %v366_v31 = vadd.s32 224, %v2104_v3  ;;  %v726_v32 = vsel %vm717_vm0, %v705_v1, %v707_v55 }
 0x108   : > { %1623 = vmatpush1.bf16.msra.mxu0 %v1622_v48  ;;  %v919_v18 = vadd.f32 %v855_v12, %v644_v0  ;;  %v999_v56 = vmul.f32 %v2184_v45, %v917_v6  ;;  %v852_v19 = vmul.f32 %v2234_v21, %v728_v49  ;;  %v854_v23 = vmul.f32 %v2234_v21, %v726_v32 }
 0x109   : > { %v1082_v46 = vmul.f32 %v2259_v39, %v914_v14  ;;  %vm435_vm3 = vcmp.eq.s32.totalorder %v366_v31, %v2131_v17  ;;  %v648_v63 = vmul.f32 %v2155_v27, %v2159_v30  ;;  %v1085_v28 = vmul.f32 %v2200_v51, %v917_v6 }
 0x10a   : > { %v1001_v5 = vmul.f32 %v2184_v45, %v919_v18  ;;  %v1145_v24 = vadd.f32 %v1081_v36, %v999_v56  ;;  %v916_v22 = vadd.f32 %v852_v19, %v641_v10  ;;  %v1554_v35 = vsel %vm435_vm3, 1.0, %v1899_v2 }
 0x10b   : > { %v918_v41 = vadd.f32 %v854_v23, %v643_v25  ;;  %v646_v47 = vmul.f32 %v1554_v35, %v2159_v30  ;;  %v710_v11 = vrot.slane %v1554_v35, 7  ;;  %v1087_v17 = vmul.f32 %v2200_v51, %v919_v18 }
 0x10c   : > { %v1147_v16 = vadd.f32 %v1083_v26, %v1001_v5  ;;  %v998_v14 = vmul.f32 %v2256_v37, %v916_v22  ;;  %vm434_vm4 = vcmp.eq.s32.totalorder %v366_v31, %v2135_v20  ;;  %v647_v27 = vmul.f32 %v2207_v54, %v2215_v61  ;;  %v1156_v26 = vld [vmem:[%s2090_s8] sm:$0xff]  ;;  %v1232_v5 = vld [vmem:[#allocation2 + $0x8] sm:$0xff] }
 0x10d   : > { %v1000_v50 = vmul.f32 %v2256_v37, %v918_v41  ;;  %v723_v36 = vsel %vm717_vm0, %v710_v11, %v712_v33  ;;  %v725_v30 = vsel %vm717_vm0, %v708_v4, %v710_v11  ;;  %v1553_v62 = vsel %vm434_vm4, 1.0, %v1899_v2 }
 0x10e   : > { %v1624_v13 = vpack.c.bf16 %v1147_v16, %v1145_v24  ;;  %v1144_v34 = vadd.f32 %v1080_v29, %v998_v14  ;;  %v857_v52 = vmul.f32 %v2181_v44, %v725_v30  ;;  %v859_v8 = vmul.f32 %v2181_v44, %v723_v36 }
 0x10f   : > { %v1146_v0 = vadd.f32 %v1082_v46, %v1000_v50  ;;  %v645_v20 = vmul.f32 %v1553_v62, %v2215_v61  ;;  %v709_v38 = vrot.slane %v1553_v62, 7  ;;  %v1084_v4 = vmul.f32 %v2259_v39, %v916_v22 }
 0x110   : > { %1625 = vmatprep.subr.bf16.mxu0 %v1624_v13  ;;  %v921_v33 = vadd.f32 %v857_v52, %v646_v47  ;;  %v923_v60 = vadd.f32 %v859_v8, %v648_v63  ;;  %v1007_v2 = vmul.f32 %v2184_v45, %v2209_v57  ;;  %v1009_v61 = vmul.f32 %v2184_v45, %v2211_v58  ;;  %v1233_v63 = vld [vmem:[%s2098_s20] sm:$0xff] }
 0x111   : > { %v1626_v53 = vpack.c.bf16 %v1146_v0, %v1144_v34  ;;  %v722_v44 = vsel %vm717_vm0, %v709_v38, %v711_v15  ;;  %v724_v7 = vsel %vm717_vm0, %v707_v55, %v709_v38  ;;  %v1086_v54 = vmul.f32 %v2259_v39, %v918_v41 }
 0x112   : > { %v1003_v40 = vmul.f32 %v2184_v45, %v921_v33  ;;  %v1005_v9 = vmul.f32 %v2184_v45, %v923_v60  ;;  %v856_v59 = vmul.f32 %v2234_v21, %v724_v7  ;;  %v858_v57 = vmul.f32 %v2234_v21, %v722_v44 }
 0x113   : > { %1627 = vmatpush1.bf16.msra.mxu0 %v1626_v53  ;;  %v1089_v15 = vmul.f32 %v2200_v51, %v921_v33  ;;  %v1091_v3 = vmul.f32 %v2200_v51, %v923_v60  ;;  %v1006_v10 = vmul.f32 %v2256_v37, %v2263_v42  ;;  %v1008_v21 = vmul.f32 %v2256_v37, %v2265_v43 }
 0x114   : > { %v1149_v58 = vadd.f32 %v1085_v28, %v1003_v40  ;;  %v1151_v1 = vadd.f32 %v1087_v17, %v1005_v9  ;;  %v920_v48 = vadd.f32 %v856_v59, %v645_v20  ;;  %v922_v12 = vadd.f32 %v858_v57, %v647_v27 }
 0x115   : > { %v1153_v45 = vadd.f32 %v1089_v15, %v1007_v2  ;;  %v1155_v6 = vadd.f32 %v1091_v3, %v1009_v61  ;;  %v1158_v55 = vcombine.high %v1156_v26, %v1156_v26  ;;  %vm1238_vm0 = vcmask 1043456  }
 0x116   : > { %v1628_v25 = vpack.c.bf16 %v1151_v1, %v1149_v58  ;;  %v1002_v49 = vmul.f32 %v2256_v37, %v920_v48  ;;  %v1004_v29 = vmul.f32 %v2256_v37, %v922_v12  ;;  %v1088_v51 = vmul.f32 %v2259_v39, %v920_v48 }
 0x117   : > { %v1090_v31 = vmul.f32 %v2259_v39, %v922_v12  ;;  %1224 = vmatprep.mubr.f32.mxu0 %v1158_v55  ;;  %v1632_v32 = vpack.c.bf16 %v1155_v6, %v1153_v45  ;;  %vm1234_vm5 = vcmask 31744   ;;  %v1231_v39 = vld [vmem:[#allocation2] sm:$0xff] }
 0x118   : > { %1629 = vmatprep.subr.bf16.mxu0 %v1628_v25  ;;  %v1148_v42 = vadd.f32 %v1084_v4, %v1002_v49  ;;  %v1150_v18 = vadd.f32 %v1086_v54, %v1004_v29  ;;  %v1152_v56 = vadd.f32 %v1088_v51, %v1006_v10 }
 0x119   : > { %v1154_v19 = vadd.f32 %v1090_v31, %v1008_v21 }
 0x11a   : > { %v1630_v23 = vpack.c.bf16 %v1150_v18, %v1148_v42 }
 0x11b   : > { %v1634_v43 = vpack.c.bf16 %v1154_v19, %v1152_v56 }
 0x11c   : > { %1631 = vmatpush1.bf16.msra.mxu0 %v1630_v23 }
 0x11d   : > { %1633 = vmatprep.subr.bf16.mxu0 %v1632_v32 }
 0x120   : > { %1635 = vmatpush1.bf16.msra.mxu0 %v1634_v43 }
 0x123   : > { %1225 = vmatmul.mubr.f32.vlgmr.msra.gmra.mrb[0].mxu0 %v1156_v26 }
 0x1f6   : > { %v1226_v37 = vpop.f32.mrb[0].mxu0 }
 0x1f7   : > { %v1228_v46 = vpop.f32.mrb[1].mxu0 }
 0x1f8   : > { %1561 = vmatprep.subr.msk.mxu1 %vm1238_vm0, %v1228_v46 }
 0x1f9   : > { %1562 = vmatpush1.msk.msra.mxu1 %vm1238_vm0, %v1226_v37 }
 0x1fa   : > { %1563 = vmatmul.mubr.msk.f32.vlgmr.msra.gmra.mrb[0].mxu1 %vm1234_vm5, %v1233_v63 }
 0x2cb   : > { %1323 = sbr.rel (%p1564_p4) target bundleno = 730 (0x2da), region = 48 }
 0x2cd   : > { %v1311_v24 = vpop.f32.mrb[0].mxu1 }
 0x2ce   : > { %v1316_v22 = vadd.f32 %v1311_v24, %v1231_v39  ;;  %v1313_v35 = vpop.f32.mrb[1].mxu1 }
 0x2cf   : > { %v1317_v41 = vadd.f32 %v1313_v35, %v1232_v5 }
 0x2d0   : > { %1318 = vst [vmem:[#allocation2] sm:$0xff] %v1316_v22 }
 0x2d1   : > { %1319 = vst [vmem:[#allocation2 + $0x8] sm:$0xff] %v1317_v41 }
 0x2d7   : > { %v1324_v47 = vld [vmem:[#allocation2] sm:$0xff] }
 0x2d8   : > { %v1325_v11 = vld [vmem:[#allocation2 + $0x8] sm:$0xff]  ;;  %1326 = vst [vmem:[%s2100_s12] sm:$0xff] %v1324_v47 }
 0x2d9   : > { %1327 = vst [vmem:[%s2100_s12 + $0x8] sm:$0xff] %v1325_v11 }
 0x2da PF: > { %s1571_s1 = sshll.u32 %s1883_s22, 8  ;;  %s1345_s13 = sshll.u32 %s2100_s12, 4  ;;  %s1346_s13 = int_to_ptr.vmem [resolvable:$true] %s1345_s13 }
 0x2db   : > { %s2805_s24 = scalar_lea.hbm %s2868_s4, %s1571_s1  ;;  %s2894_s21 = sand.u32 1, %s1859_s16  }
 0x2dc   : > { %s1329_s20 = scalar_lea.sflag [#allocation5], %s2894_s21  ;;  %s1773_s29 = scalar_lea.vmem %s1346_s13, 256 }
 0x2dd   : > { %p1774_p10 = scmp.ne.s32.totalorder %s1346_s13, %s1773_s29  ;;  %p2895_p1 = scmp.ne.s32.totalorder %s2886_s11, 0 }
 0x2de   : > { %s1900_s30 = smov [#allocation6]  }
 0x2df   : > { %p1775_p3 = pnand %p1774_p10, %p2895_p1  ;;  %s1777_s6 = sshll.u32 %s1900_s30, 4  ;;  %s1778_s6 = int_to_ptr.vmem [resolvable:$false] %s1777_s6 }
 0x2e0   : > { %s1779_s10 = scalar_lea.vmem %s1778_s6, 512  ;;  %p1780_p11 = scmp.lt.s32.totalorder %s1346_s13, %s1778_s6 }
 0x2e1   : > { %p1776_p9 = pneg %p1775_p3  ;;  %p1781_p13 = scmp.lt.s32.totalorder %s1779_s10, %s1773_s29 }
 0x2e3   : > { %p1782_p0 = por %p1781_p13, %p1780_p11 }
 0x2e5   : > { %p1783_p5 = pnand %p1782_p0, %p1776_p9 }
 0x2e7   : > { %1786 = shalt.err (!%p1783_p5)
}
 0x2e8   : > { %s1787_s22 = scalar_lea.hbm %s2805_s24, 256  ;;  %s1791_s27 = scalar_lea.hbm %s2868_s4, 512 }
 0x2e9   : > { %p1788_p6 = scmp.ne.s32.totalorder %s2805_s24, %s1787_s22  ;;  %p1792_p2 = scmp.lt.u32.totalorder %s2805_s24, %s2868_s4 }
 0x2ea   : > { %p1793_p7 = scmp.lt.u32.totalorder %s1791_s27, %s1787_s22  ;;  %p1795_p10 = scmp.lt.u32.totalorder %s1787_s22, %s2805_s24 }
 0x2eb   : > { %p1789_p8 = pnand %p1788_p6, %p2895_p1 }
 0x2ec   : > { %p1794_p4 = por %p1793_p7, %p1792_p2 }
 0x2ed   : > { %p1790_p12 = pneg %p1789_p8 }
 0x2ee   : > { %p1796_p3 = por %p1795_p10, %p1794_p4 }
 0x2f0   : > { %p1797_p9 = pnand %p1796_p3, %p1790_p12 }
 0x2f2   : > { %1800 = shalt.err (!%p1797_p9)
}
 0x2f3   : > { %1640 = dma.vmem_to_hbm [thread:$0]  (%p2895_p1), %s1346_s13, 256, %s2805_s24, %s1329_s20  }
 0x2f4 PF: > { %p1651_p11 = scmp.ge.s32.totalorder %s1895_s25, 2  ;;  %s1357_s8 = sand.u32 1, %s1855_s15  }
 0x2f5   : > { %p2896_p13 = scmp.ne.s32.totalorder %s2889_s14, 0  ;;  %s1358_s26 = scalar_lea.sflag [#allocation5], %s1357_s8 }
 0x2f7   : > { %p1647_p0 = pnand %p1651_p11, %p2896_p13 }
 0x2f9   : > { %1850 = dma.done.wait (!%p1647_p0), %s1358_s26, 256  }
 0x2fa   : > { %1852 = vsyncadd (!%p1647_p0), %s1358_s26, 4294967040  ;;  %s20_s25 = sadd.s32 1, %s1895_s25   ;;  %s2897_s9 = sld [smem:[#allocation15_spill]] }
 0x2fb   : > { %p17_p5 = scmp.ge.s32.totalorder %s20_s25, 20   ;;  %s2898_s18 = sld [smem:[#allocation9_spill]] }
 0x2fc   : > { %s2899_s19 = sld [smem:[#allocation10_spill]]  ;;  %s2900_s20 = sld [smem:[#allocation16_spill]] }
 0x2fd   : > { %s2901_s21 = sld [smem:[#allocation11_spill]]  ;;  %s2902_s22 = sld [smem:[#allocation12_spill]] }
 0x2fe   : > { %s2903_s23 = sld [smem:[#allocation13_spill]]  ;;  %s2904_s24 = sld [smem:[#allocation14_spill]] }
 0x2ff   : > { %s2905_s15 = smov %s1859_s16  ;;  %s2906_s16 = smov %s1863_s17 }
 0x300   : > { %s2907_s17 = smov %s2897_s9  ;;  %19 = sbr.rel (!%p17_p5) target bundleno = 11 (0xb), region = 98 }
 0x307   :  { %1363 = vsyncpa [#allocation4], 1 }
 0x308   :  { %1365 = vsyncpa [#allocation4 + $0x1], 1 }
 0x309   :  { %1366 = vsyncpa [#allocation5], 1 }
 0x30a   :  { %1368 = vsyncpa [#allocation5 + $0x1], 1 }

</bundles_post_ra>
